<compile_context>
chip_gen: v7x
topology: tpu7x:2x2x1
jax: 0.10.0
libtpu: 0.0.40
codegen_flags: <defaults>
</compile_context>

<pallas_src>
import numpy as np
import jax
import jax.numpy as jnp
from jax.experimental import pallas as pl
from jax.experimental.pallas import tpu as pltpu

# ----------------------------------------------------------------------------
# Hyper-parameters implied by the module (__init__ with skip_res=3).
# ----------------------------------------------------------------------------
SKIP_RES   = 3
PATCHSIZE  = 4
WIDTH      = 32
N_RES      = 10                                                 # n_residues
INPUT_SIZE = (N_RES - SKIP_RES) * (N_RES - SKIP_RES + 1) // 2   # 28 pair distances
NUM_W      = N_RES + PATCHSIZE - 1                              # 13 window weights
FAC        = float(NUM_W)                                       # fac=True

LANES   = 128          # lane-dense feature axis (28 logical features, zero padded)
BLOCK_B = 256          # batch rows per grid step

# Packed-parameter buffer layout (rows are 8-aligned per block).
ROW_W0 = 0             # rows   0..127 : w0 zero-padded to (128, WIDTH), cols 0:WIDTH
ROW_WS = 128           # rows 128..159 : ws (WIDTH, NUM_W),              cols 0:NUM_W
ROW_B0 = 160           # row        160: b0 (WIDTH,),                    cols 0:WIDTH
ROW_BS = 161           # row        161: bs (NUM_W,),                    cols 0:NUM_W
ROW_G  = 168           # rows 168..177 : fused gather G (N_RES, 256)
P_ROWS = 184           # padded to a multiple of 8
P_COLS = 256

# residue pair index lists, exactly as built in the torch __init__
_res1, _res2 = [], []
for _n1 in range(N_RES - SKIP_RES):
    for _n2 in range(_n1 + SKIP_RES, N_RES):
        _res1.append(_n1)
        _res2.append(_n2)
assert len(_res1) == INPUT_SIZE

RES1 = np.asarray(_res1, dtype=np.int32)
RES2 = np.asarray(_res2, dtype=np.int32)

# one-hot gather matrices: (wr @ G1)[:, p] == wr[:, RES1[p]]
G1_NP = np.zeros((N_RES, INPUT_SIZE), dtype=np.float32)
G2_NP = np.zeros((N_RES, INPUT_SIZE), dtype=np.float32)
G1_NP[RES1, np.arange(INPUT_SIZE)] = 1.0
G2_NP[RES2, np.arange(INPUT_SIZE)] = 1.0


def pack_params(w0, b0, ws, bs):
    """Pack all small parameters (and the static gather matrices) into one buffer."""
    p = jnp.zeros((P_ROWS, P_COLS), jnp.float32)
    p = p.at[ROW_W0:ROW_W0 + INPUT_SIZE, 0:WIDTH].set(w0)        # padded rows stay 0
    p = p.at[ROW_WS:ROW_WS + WIDTH, 0:NUM_W].set(ws)
    p = p.at[ROW_B0, 0:WIDTH].set(b0)
    p = p.at[ROW_BS, 0:NUM_W].set(bs)
    # fused gather: cols 0..127 hold G1 (padded), cols 128..255 hold G2 (padded)
    p = p.at[ROW_G:ROW_G + N_RES, 0:INPUT_SIZE].set(jnp.asarray(G1_NP))
    p = p.at[ROW_G:ROW_G + N_RES, LANES:LANES + INPUT_SIZE].set(jnp.asarray(G2_NP))
    return p


# ----------------------------------------------------------------------------
# Pallas kernel: the entire Mask.forward hot path for one (BLOCK_B, 128) block.
# ----------------------------------------------------------------------------
def mask_kernel(x_ref, p_ref, o_ref):
    x = x_ref[...]                                               # (BLOCK_B, 128) f32

    w0 = p_ref[ROW_W0:ROW_W0 + LANES, 0:WIDTH]                   # (128, 32) zero-padded
    ws = p_ref[ROW_WS:ROW_WS + WIDTH, 0:NUM_W]                   # (32, 13)
    b0 = p_ref[ROW_B0:ROW_B0 + 1, 0:WIDTH]                       # (1, 32)
    bs = p_ref[ROW_BS:ROW_BS + 1, 0:NUM_W]                       # (1, 13)
    g  = p_ref[ROW_G:ROW_G + N_RES, :]                           # (10, 256) fused G1|G2

    # hfc: Linear(input_size -> width)   (no nonlinearity in the reference)
    h = jnp.dot(x, w0, preferred_element_type=jnp.float32) + b0

    # softmax head: Linear(width -> number_weights)
    logits = jnp.dot(h, ws, preferred_element_type=jnp.float32) + bs

    # F.softmax(dim=1) * fac
    z = logits - jnp.max(logits, axis=1, keepdims=True)
    e = jnp.exp(z)
    y = (e / jnp.sum(e, axis=1, keepdims=True)) * FAC            # (BLOCK_B, NUM_W)

    # sliding-window product over patchsize: w[:, n] = prod_i y[:, n + i]
    w = y[:, 0:N_RES]
    for i in range(1, PATCHSIZE):
        w = w * y[:, i:i + N_RES]                                # (BLOCK_B, N_RES)

    # second F.softmax(dim=1)
    z2 = w - jnp.max(w, axis=1, keepdims=True)
    e2 = jnp.exp(z2)
    wr = e2 / jnp.sum(e2, axis=1, keepdims=True)                 # (BLOCK_B, N_RES)

    # fused pair gather (one MXU pass produces both weight_1 and weight_2),
    # then the attention scaling; padded lanes of g are zero so alpha is 0 there.
    wg = jnp.dot(wr, g, preferred_element_type=jnp.float32)      # (BLOCK_B, 256)
    alpha = wg[:, 0:LANES] * wg[:, LANES:2 * LANES] * float(N_RES * N_RES)

    o_ref[...] = (x * alpha).astype(o_ref.dtype)
    # TODO(synk): noise > 0 branch (torch.randn perturbation scaled by attention)
    # is not implemented; module default noise=0.0 makes it a no-op.


@jax.jit
def mask_forward(x, params):
    """x: (B, INPUT_SIZE) f32, params: packed (P_ROWS, P_COLS) f32 -> (B, INPUT_SIZE)."""
    b = x.shape[0]
    b_pad = ((b + BLOCK_B - 1) // BLOCK_B) * BLOCK_B
    # lane-dense, batch-padded input (features 28 -> 128, rows padded with zeros)
    x_p = jnp.zeros((b_pad, LANES), jnp.float32).at[:b, :INPUT_SIZE].set(x)

    out_p = pl.pallas_call(
        mask_kernel,
        out_shape=jax.ShapeDtypeStruct((b_pad, LANES), jnp.float32),
        grid=(b_pad // BLOCK_B,),
        in_specs=[
            pl.BlockSpec((BLOCK_B, LANES), lambda i: (i, 0)),     # x block
            pl.BlockSpec((P_ROWS, P_COLS), lambda i: (0, 0)),     # params: fetched once
        ],
        out_specs=pl.BlockSpec((BLOCK_B, LANES), lambda i: (i, 0)),
        input_output_aliases={0: 0},                              # out written onto x_p
        compiler_params=pltpu.CompilerParams(
            dimension_semantics=("parallel",)),
    )(x_p, params)
    return out_p[:b, :INPUT_SIZE]


# ----------------------------------------------------------------------------
# Pure-JAX reference (mirrors the PyTorch forward) for a sanity check.
# ----------------------------------------------------------------------------
def ref_forward(x, w0, b0, ws, bs):
    h = x @ w0 + b0
    logits = h @ ws + bs
    y = jax.nn.softmax(logits, axis=1) * FAC
    w = y[:, 0:N_RES]
    for i in range(1, PATCHSIZE):
        w = w * y[:, i:i + N_RES]
    wr = jax.nn.softmax(w, axis=1)
    alpha = wr[:, RES1] * wr[:, RES2] * (N_RES ** 2)
    return x * alpha


if __name__ == "__main__":
    key = jax.random.PRNGKey(0)
    kx, k0, k1, k2, k3 = jax.random.split(key, 5)

    BATCH = 500  # non-multiple of BLOCK_B on purpose (exercises batch padding)
    x = jax.random.normal(kx, (BATCH, INPUT_SIZE), dtype=jnp.float32)

    # deterministic "parameters" (torch.nn.Linear-style uniform init, synthetic)
    lim0 = 1.0 / np.sqrt(INPUT_SIZE)
    lims = 1.0 / np.sqrt(WIDTH)
    w0 = jax.random.uniform(k0, (INPUT_SIZE, WIDTH), jnp.float32, -lim0, lim0)
    b0 = jax.random.uniform(k1, (WIDTH,), jnp.float32, -lim0, lim0)
    ws = jax.random.uniform(k2, (WIDTH, NUM_W), jnp.float32, -lims, lims)
    bs = jax.random.uniform(k3, (NUM_W,), jnp.float32, -lims, lims)

    params = pack_params(w0, b0, ws, bs)

    out = jax.block_until_ready(mask_forward(x, params))

    ref = ref_forward(x, w0, b0, ws, bs)
    np.testing.assert_allclose(np.asarray(out), np.asarray(ref), rtol=2e-3, atol=2e-3)

    print("KERNEL_OK")
</pallas_src>

<mosaic_0001>
module attributes {stable_mosaic.version = 11 : i64} {
  func.func @mask_kernel(%arg0: i32, %arg1: memref<256x128xf32, #tpu.memory_space<vmem>>, %arg2: memref<184x256xf32, #tpu.memory_space<vmem>>, %arg3: memref<256x128xf32, #tpu.memory_space<vmem>>) attributes {dimension_semantics = [#tpu.dimension_semantics<parallel>], iteration_bounds = array<i64: 2>, scalar_prefetch = 0 : i64, scratch_operands = 0 : i64, tpu.core_type = #tpu.core_type<tc>, window_params = [{transform_indices = @transform_0, window_bounds = array<i64: 256, 128>}, {pipeline_mode = #tpu.pipeline_mode<synchronous>, transform_indices = @transform_1, window_bounds = array<i64: 184, 256>}, {transform_indices = @transform_2, window_bounds = array<i64: 256, 128>}]} {
    %c0 = arith.constant 0 : index
    %c0_0 = arith.constant 0 : index
    %0 = vector.load %arg1[%c0, %c0_0] : memref<256x128xf32, #tpu.memory_space<vmem>>, vector<256x128xf32>
    %c0_1 = arith.constant 0 : index
    %c0_2 = arith.constant 0 : index
    %1 = vector.load %arg2[%c0_1, %c0_2] : memref<184x256xf32, #tpu.memory_space<vmem>>, vector<128x32xf32>
    %c128 = arith.constant 128 : index
    %c0_3 = arith.constant 0 : index
    %2 = vector.load %arg2[%c128, %c0_3] : memref<184x256xf32, #tpu.memory_space<vmem>>, vector<32x13xf32>
    %c160 = arith.constant 160 : index
    %c0_4 = arith.constant 0 : index
    %3 = vector.load %arg2[%c160, %c0_4] : memref<184x256xf32, #tpu.memory_space<vmem>>, vector<1x32xf32>
    %c161 = arith.constant 161 : index
    %c0_5 = arith.constant 0 : index
    %4 = vector.load %arg2[%c161, %c0_5] : memref<184x256xf32, #tpu.memory_space<vmem>>, vector<1x13xf32>
    %c168 = arith.constant 168 : index
    %c0_6 = arith.constant 0 : index
    %5 = vector.load %arg2[%c168, %c0_6] : memref<184x256xf32, #tpu.memory_space<vmem>>, vector<10x256xf32>
    %cst = arith.constant dense<0.000000e+00> : vector<256x32xf32>
    %6 = tpu.matmul %0, %1, %cst {dimension_numbers = #tpu.dot_dimension_numbers<[1], [0], [0], [1], [0, 0, 1, 1], [], []>} : vector<256x128xf32>, vector<128x32xf32>, vector<256x32xf32> -> vector<256x32xf32>
    %7 = vector.broadcast %3 : vector<1x32xf32> to vector<256x32xf32>
    %8 = arith.addf %6, %7 : vector<256x32xf32>
    %cst_7 = arith.constant dense<0.000000e+00> : vector<256x13xf32>
    %9 = tpu.matmul %8, %2, %cst_7 {dimension_numbers = #tpu.dot_dimension_numbers<[1], [0], [0], [1], [0, 0, 1, 1], [], []>} : vector<256x32xf32>, vector<32x13xf32>, vector<256x13xf32> -> vector<256x13xf32>
    %10 = vector.broadcast %4 : vector<1x13xf32> to vector<256x13xf32>
    %11 = arith.addf %9, %10 : vector<256x13xf32>
    %cst_8 = arith.constant dense<0xFF800000> : vector<256xf32>
    %12 = vector.multi_reduction <maximumf>, %11, %cst_8 [1] : vector<256x13xf32> to vector<256xf32>
    %13 = vector.shape_cast %12 : vector<256xf32> to vector<256x1xf32>
    %14 = vector.broadcast %13 : vector<256x1xf32> to vector<256x13xf32>
    %15 = arith.subf %11, %14 : vector<256x13xf32>
    %16 = math.exp %15 : vector<256x13xf32>
    %cst_9 = arith.constant dense<0.000000e+00> : vector<256xf32>
    %17 = vector.multi_reduction <add>, %16, %cst_9 [1] : vector<256x13xf32> to vector<256xf32>
    %18 = vector.shape_cast %17 : vector<256xf32> to vector<256x1xf32>
    %19 = vector.broadcast %18 : vector<256x1xf32> to vector<256x13xf32>
    %20 = arith.divf %16, %19 : vector<256x13xf32>
    %cst_10 = arith.constant 1.300000e+01 : f32
    %21 = vector.broadcast %cst_10 : f32 to vector<256x13xf32>
    %22 = arith.mulf %20, %21 : vector<256x13xf32>
    %23 = vector.extract_strided_slice %22 {offsets = [0, 0], sizes = [256, 10], strides = [1, 1]} : vector<256x13xf32> to vector<256x10xf32>
    %24 = vector.extract_strided_slice %22 {offsets = [0, 1], sizes = [256, 10], strides = [1, 1]} : vector<256x13xf32> to vector<256x10xf32>
    %25 = arith.mulf %23, %24 : vector<256x10xf32>
    %26 = vector.extract_strided_slice %22 {offsets = [0, 2], sizes = [256, 10], strides = [1, 1]} : vector<256x13xf32> to vector<256x10xf32>
    %27 = arith.mulf %25, %26 : vector<256x10xf32>
    %28 = vector.extract_strided_slice %22 {offsets = [0, 3], sizes = [256, 10], strides = [1, 1]} : vector<256x13xf32> to vector<256x10xf32>
    %29 = arith.mulf %27, %28 : vector<256x10xf32>
    %cst_11 = arith.constant dense<0xFF800000> : vector<256xf32>
    %30 = vector.multi_reduction <maximumf>, %29, %cst_11 [1] : vector<256x10xf32> to vector<256xf32>
    %31 = vector.shape_cast %30 : vector<256xf32> to vector<256x1xf32>
    %32 = vector.broadcast %31 : vector<256x1xf32> to vector<256x10xf32>
    %33 = arith.subf %29, %32 : vector<256x10xf32>
    %34 = math.exp %33 : vector<256x10xf32>
    %cst_12 = arith.constant dense<0.000000e+00> : vector<256xf32>
    %35 = vector.multi_reduction <add>, %34, %cst_12 [1] : vector<256x10xf32> to vector<256xf32>
    %36 = vector.shape_cast %35 : vector<256xf32> to vector<256x1xf32>
    %37 = vector.broadcast %36 : vector<256x1xf32> to vector<256x10xf32>
    %38 = arith.divf %34, %37 : vector<256x10xf32>
    %cst_13 = arith.constant dense<0.000000e+00> : vector<256x256xf32>
    %39 = tpu.matmul %38, %5, %cst_13 {dimension_numbers = #tpu.dot_dimension_numbers<[1], [0], [0], [1], [0, 0, 1, 1], [], []>} : vector<256x10xf32>, vector<10x256xf32>, vector<256x256xf32> -> vector<256x256xf32>
    %40 = vector.extract_strided_slice %39 {offsets = [0, 0], sizes = [256, 128], strides = [1, 1]} : vector<256x256xf32> to vector<256x128xf32>
    %41 = vector.extract_strided_slice %39 {offsets = [0, 128], sizes = [256, 128], strides = [1, 1]} : vector<256x256xf32> to vector<256x128xf32>
    %42 = arith.mulf %40, %41 : vector<256x128xf32>
    %cst_14 = arith.constant 1.000000e+02 : f32
    %43 = vector.broadcast %cst_14 : f32 to vector<256x128xf32>
    %44 = arith.mulf %42, %43 : vector<256x128xf32>
    %45 = arith.mulf %0, %44 : vector<256x128xf32>
    %c0_15 = arith.constant 0 : index
    %c0_16 = arith.constant 0 : index
    %46 = vector.load %arg3[%c0_15, %c0_16] : memref<256x128xf32, #tpu.memory_space<vmem>>, vector<256x128xf32>
    tpu.vector_store %arg3[%c0_15, %c0_16], %45 {strides = array<i32>} : memref<256x128xf32, #tpu.memory_space<vmem>>, vector<256x128xf32>,
    return
  }
  func.func @transform_0(%arg0: i32) -> (i32, i32) {
    %c0_i32 = arith.constant 0 : i32
    %c0_i32_0 = arith.constant 0 : i32
    return %arg0, %c0_i32 : i32, i32
  }
  func.func @transform_1(%arg0: i32) -> (i32, i32) {
    %c0_i32 = arith.constant 0 : i32
    %c0_i32_0 = arith.constant 0 : i32
    %c0_i32_1 = arith.constant 0 : i32
    return %c0_i32, %c0_i32_0 : i32, i32
  }
  func.func @transform_2(%arg0: i32) -> (i32, i32) {
    %c0_i32 = arith.constant 0 : i32
    %c0_i32_0 = arith.constant 0 : i32
    return %arg0, %c0_i32 : i32, i32
  }
}

</mosaic_0001>

<bundles_post_ra>
// kernel: mask_forward.1
= control target key start
LH: loop header
LB: loop body
LE: loop exit
PB: predicated region body
PF: predicated region fallthrough
CT: control target
= control target key end

     0   :  { %s3095_s9 = smov 0   ;;  %s4701_s0 = inlined_call_operand.vmem [shape: f32[512,128], index: 0, kind: input, shape index: {}, may-alias: {0,2}]   ;;  %s4702_s1 = inlined_call_operand.vmem [shape: f32[184,256], index: 1, kind: input, shape index: {}]   ;;  %s4703_s2 = inlined_call_operand.vmem [shape: f32[512,128], index: 2, kind: output, shape index: {}, may-alias: {0,2}]  }
   0x1 LB: > { %s2450_s10 = sadd.s32 4294967295, %s3073_s9   ;;  %p2454_p0 = scmp.ge.s32.totalorder %s3073_s9, 1  ;;  %s3073_s9 = sphi %s3095_s9, %s12_s9  }
   0x2   : > { %p113_p1 = scmp.lt.s32.totalorder %s3073_s9, 3 }
   0x4   : > { %p114_p2 = pnand %p2454_p0, %p113_p1 }
   0x6   : > { %117 = sbr.rel (%p114_p2) target bundleno = 1727 (0x6bf), region = 28 }
   0xd   : > { %v179_v0 = vld [vmem:[%s4702_s1] sm:$0xff]  ;;  %v180_v1 = vld [vmem:[%s4702_s1 + $0x10] sm:$0xff]  ;;  %s2455_s17 = sshll.u32 %s2450_s10, 5  ;;  %vm430_vm0 = vcmask 261120   ;;  %vm752_vm1 = vcmask 105472   ;;  %s3075_s8 = smov 126  }
   0xe   : > { %v181_v2 = vld [vmem:[%s4702_s1 + $0x20] sm:$0xff]  ;;  %v2747_v3 = vpack.c.bf16 %v180_v1, %v179_v0  ;;  %v182_v4 = vld [vmem:[%s4702_s1 + $0x30] sm:$0xff]  ;;  %p136_p3 = scmp.lt.s32.totalorder %s2455_s17, 63  ;;  %s3076_s10 = smov 127   ;;  %vm1553_vm2 = vcmask 80896   ;;  %vm2002_vm3 = vcmask 1041408  }
   0xf   : > { %v2751_v5 = vpack.c.bf16 %v182_v4, %v181_v2  ;;  %v183_v6 = vld [vmem:[%s4702_s1 + $0x40] sm:$0xff]  ;;  %v184_v7 = vld [vmem:[%s4702_s1 + $0x50] sm:$0xff]  ;;  %s3077_s11 = smov 125   ;;  %vm3078_vm4 = vmmov 1  }
  0x10   : > { %2748 = vmatprep.subr.bf16.mxu0 %v2747_v3  ;;  %s4859_s17 = smov (!%p136_p3, %s2455_s17), 63  ;;  %v2755_v8 = vpack.c.bf16 %v184_v7, %v183_v6  ;;  %v185_v9 = vld [vmem:[%s4702_s1 + $0x60] sm:$0xff]  ;;  %v196_v11 = vld [vmem:[%s4702_s1 + $0x110] sm:$0xff]  ;;  %vm2788_vm5 = vmpackc.low %vm2002_vm3, %vm3078_vm4 }
  0x11   : > { %2750 = vmatpush3.bf16.msra.mxu0 %v2747_v3  ;;  %s2456_s26 = sshll.u32 %s4859_s17, 3  ;;  %v195_v10 = vld [vmem:[%s4702_s1 + $0x100] sm:$0xff]  ;;  %v186_v12 = vld [vmem:[%s4702_s1 + $0x70] sm:$0xff] }
  0x12   : > { %2752 = vmatprep.subr.bf16.mxu0 %v2751_v5  ;;  %s3141_s7 = scalar_lea.vmem %s4701_s0, %s2456_s26  ;;  %v197_v13 = vld [vmem:[%s4702_s1 + $0x120] sm:$0xff]  ;;  %v198_v14 = vld [vmem:[%s4702_s1 + $0x130] sm:$0xff]  ;;  %v2779_v16 = vpack.c.bf16 %v196_v11, %v195_v10  ;;  %v2759_v17 = vpack.c.bf16 %v186_v12, %v185_v9  ;;  %s4632_s23 = scalar_lea.vmem %s4703_s2, %s2456_s26 }
  0x13   : > { %v147_v15 = vld [vmem:[%s3141_s7] sm:$0xff]  ;;  %v2783_v18 = vpack.c.bf16 %v198_v14, %v197_v13  ;;  %v188_v20 = vld [vmem:[%s4702_s1 + $0x90] sm:$0xff]  ;;  %v3175_v31 = vld [vmem:[%s3141_s7 + $0x8] sm:$0xff] }
  0x14   : > { %2643 = vmatprep.mubr.f32.mxu0 %v147_v15  ;;  %2793 = vmatprep.subr.bf16.mxu1 %v2779_v16  ;;  %v187_v19 = vld [vmem:[%s4702_s1 + $0x80] sm:$0xff]  ;;  %v190_v23 = vld [vmem:[%s4702_s1 + $0xb0] sm:$0xff]  ;;  %4754 = vst [vmem:[#allocation2_spill] sm:$0xff] %v3175_v31  ;;  %v3183_v33 = vld [vmem:[%s3141_s7 + $0x18] sm:$0xff] }
  0x15   : > { %2754 = vmatpush3.bf16.msra.mxu0 %v2751_v5  ;;  %2795 = vmatpush3.bf16.msra.mxu1 %v2779_v16  ;;  %v2763_v21 = vpack.c.bf16 %v188_v20, %v187_v19  ;;  %v189_v22 = vld [vmem:[%s4702_s1 + $0xa0] sm:$0xff]  ;;  %v192_v26 = vld [vmem:[%s4702_s1 + $0xd0] sm:$0xff]  ;;  %4756 = vst [vmem:[#allocation4_spill] sm:$0xff] %v3183_v33  ;;  %v3191_v35 = vld [vmem:[%s3141_s7 + $0x28] sm:$0xff] }
  0x16   : > { %2756 = vmatprep.subr.bf16.mxu0 %v2755_v8  ;;  %2794 = vmatprep.subr.bf16.mxu1 %v2783_v18  ;;  %v2767_v24 = vpack.c.bf16 %v190_v23, %v189_v22  ;;  %v191_v25 = vld [vmem:[%s4702_s1 + $0xc0] sm:$0xff]  ;;  %v194_v29 = vld [vmem:[%s4702_s1 + $0xf0] sm:$0xff]  ;;  %4758 = vst [vmem:[#allocation6_spill] sm:$0xff] %v3191_v35  ;;  %v3199_v37 = vld [vmem:[%s3141_s7 + $0x38] sm:$0xff] }
  0x17   : > { %v2771_v27 = vpack.c.bf16 %v192_v26, %v191_v25  ;;  %v193_v28 = vld [vmem:[%s4702_s1 + $0xe0] sm:$0xff]  ;;  %v3178_v32 = vld [vmem:[%s3141_s7 + $0x10] sm:$0xff]  ;;  %4760 = vst [vmem:[#allocation8_spill] sm:$0xff] %v3199_v37  ;;  %v3207_v39 = vld [vmem:[%s3141_s7 + $0x48] sm:$0xff] }
  0x18   : > { %v2775_v30 = vpack.c.bf16 %v194_v29, %v193_v28  ;;  %4755 = vst [vmem:[#allocation3_spill] sm:$0xff] %v3178_v32  ;;  %v3186_v34 = vld [vmem:[%s3141_s7 + $0x20] sm:$0xff]  ;;  %v3194_v36 = vld [vmem:[%s3141_s7 + $0x30] sm:$0xff]  ;;  %4762 = vst [vmem:[#allocation10_spill] sm:$0xff] %v3207_v39 }
  0x19   : > { %2758 = vmatpush3.bf16.msra.mxu0 %v2755_v8  ;;  %2796 = vmatpush3.bf16.msra.mxu1 %v2783_v18  ;;  %4757 = vst [vmem:[#allocation5_spill] sm:$0xff] %v3186_v34  ;;  %4759 = vst [vmem:[#allocation7_spill] sm:$0xff] %v3194_v36  ;;  %v3202_v38 = vld [vmem:[%s3141_s7 + $0x40] sm:$0xff]  ;;  %v3210_v40 = vld [vmem:[%s3141_s7 + $0x50] sm:$0xff] }
  0x1a   : > { %2760 = vmatprep.subr.bf16.mxu0 %v2759_v17  ;;  %4761 = vst [vmem:[#allocation9_spill] sm:$0xff] %v3202_v38  ;;  %4763 = vst [vmem:[#allocation11_spill] sm:$0xff] %v3210_v40  ;;  %v3215_v41 = vld [vmem:[%s3141_s7 + $0x58] sm:$0xff]  ;;  %v3218_v42 = vld [vmem:[%s3141_s7 + $0x60] sm:$0xff] }
  0x1b   : > { %4764 = vst [vmem:[#allocation12_spill] sm:$0xff] %v3215_v41  ;;  %4765 = vst [vmem:[#allocation13_spill] sm:$0xff] %v3218_v42  ;;  %v3223_v43 = vld [vmem:[%s3141_s7 + $0x68] sm:$0xff]  ;;  %v3226_v44 = vld [vmem:[%s3141_s7 + $0x70] sm:$0xff] }
  0x1c   : > { %4766 = vst [vmem:[#allocation14_spill] sm:$0xff] %v3223_v43  ;;  %4767 = vst [vmem:[#allocation15_spill] sm:$0xff] %v3226_v44  ;;  %v3231_v45 = vld [vmem:[%s3141_s7 + $0x78] sm:$0xff]  ;;  %v3234_v46 = vld [vmem:[%s3141_s7 + $0x80] sm:$0xff] }
  0x1d   : > { %2762 = vmatpush3.bf16.msra.mxu0 %v2759_v17  ;;  %4768 = vst [vmem:[#allocation16_spill] sm:$0xff] %v3231_v45  ;;  %4769 = vst [vmem:[#allocation17_spill] sm:$0xff] %v3234_v46  ;;  %v3239_v47 = vld [vmem:[%s3141_s7 + $0x88] sm:$0xff]  ;;  %v3242_v48 = vld [vmem:[%s3141_s7 + $0x90] sm:$0xff] }
  0x1e   : > { %2764 = vmatprep.subr.bf16.mxu0 %v2763_v21  ;;  %4770 = vst [vmem:[#allocation18_spill] sm:$0xff] %v3239_v47  ;;  %4771 = vst [vmem:[#allocation19_spill] sm:$0xff] %v3242_v48  ;;  %v3247_v49 = vld [vmem:[%s3141_s7 + $0x98] sm:$0xff]  ;;  %v3250_v50 = vld [vmem:[%s3141_s7 + $0xa0] sm:$0xff] }
  0x1f   : > { %4772 = vst [vmem:[#allocation20_spill] sm:$0xff] %v3247_v49  ;;  %4773 = vst [vmem:[#allocation21_spill] sm:$0xff] %v3250_v50  ;;  %v3255_v51 = vld [vmem:[%s3141_s7 + $0xa8] sm:$0xff]  ;;  %v3258_v52 = vld [vmem:[%s3141_s7 + $0xb0] sm:$0xff] }
  0x20   : > { %4774 = vst [vmem:[#allocation22_spill] sm:$0xff] %v3255_v51  ;;  %4775 = vst [vmem:[#allocation23_spill] sm:$0xff] %v3258_v52  ;;  %v3263_v53 = vld [vmem:[%s3141_s7 + $0xb8] sm:$0xff]  ;;  %v3266_v54 = vld [vmem:[%s3141_s7 + $0xc0] sm:$0xff] }
  0x21   : > { %2766 = vmatpush3.bf16.msra.mxu0 %v2763_v21  ;;  %4776 = vst [vmem:[#allocation24_spill] sm:$0xff] %v3263_v53  ;;  %4777 = vst [vmem:[#allocation25_spill] sm:$0xff] %v3266_v54  ;;  %v3271_v55 = vld [vmem:[%s3141_s7 + $0xc8] sm:$0xff]  ;;  %v3274_v56 = vld [vmem:[%s3141_s7 + $0xd0] sm:$0xff] }
  0x22   : > { %2768 = vmatprep.subr.bf16.mxu0 %v2767_v24  ;;  %4778 = vst [vmem:[#allocation26_spill] sm:$0xff] %v3271_v55  ;;  %4779 = vst [vmem:[#allocation27_spill] sm:$0xff] %v3274_v56  ;;  %v3279_v57 = vld [vmem:[%s3141_s7 + $0xd8] sm:$0xff]  ;;  %v3282_v58 = vld [vmem:[%s3141_s7 + $0xe0] sm:$0xff] }
  0x23   : > { %4780 = vst [vmem:[#allocation28_spill] sm:$0xff] %v3279_v57  ;;  %4781 = vst [vmem:[#allocation29_spill] sm:$0xff] %v3282_v58  ;;  %v3287_v59 = vld [vmem:[%s3141_s7 + $0xe8] sm:$0xff]  ;;  %v3290_v60 = vld [vmem:[%s3141_s7 + $0xf0] sm:$0xff] }
  0x24   : > { %4782 = vst [vmem:[#allocation30_spill] sm:$0xff] %v3287_v59  ;;  %4783 = vst [vmem:[#allocation31_spill] sm:$0xff] %v3290_v60  ;;  %v3295_v61 = vld [vmem:[%s3141_s7 + $0xf8] sm:$0xff]  ;;  %v3301_v62 = vld [vmem:[%s4702_s1 + $0x140] ss:$0 sm:$0xff] }
  0x25   : > { %2770 = vmatpush3.bf16.msra.mxu0 %v2767_v24  ;;  %4784 = vst [vmem:[#allocation32_spill] sm:$0xff] %v3295_v61 }
  0x26   : > { %2772 = vmatprep.subr.bf16.mxu0 %v2771_v27 }
  0x29   : > { %2774 = vmatpush3.bf16.msra.mxu0 %v2771_v27 }
  0x2a   : > { %2776 = vmatprep.subr.bf16.mxu0 %v2775_v30 }
  0x2d   : > { %2778 = vmatpush3.bf16.msra.mxu0 %v2775_v30 }
  0x2e   : > { %2780 = vmatprep.subr.bf16.mxu0 %v2779_v16 }
  0x30   : > { %2644 = vmatmul.mubr.f32.vlgmr.msra.gmra.mrb[0].mxu0 %v3175_v31 }
  0x31   : > { %2646 = vmatprep.mubr.f32.mxu0 %v3178_v32  ;;  %2782 = vmatpush3.bf16.msra.mxu0 %v2779_v16 }
  0x32   : > { %2784 = vmatprep.subr.bf16.mxu0 %v2783_v18 }
  0x34   : > { %2647 = vmatmul.mubr.f32.gmra.mrb[2].mxu0 %v3183_v33 }
  0x35   : > { %2649 = vmatprep.mubr.f32.mxu0 %v3186_v34  ;;  %2786 = vmatpush3.bf16.msra.mxu0 %v2783_v18 }
  0x38   : > { %2650 = vmatmul.mubr.f32.gmra.mrb[4].mxu0 %v3191_v35 }
  0x39   : > { %2652 = vmatprep.mubr.f32.mxu0 %v3194_v36 }
  0x3c   : > { %2653 = vmatmul.mubr.f32.gmra.mrb[6].mxu0 %v3199_v37 }
  0x3d   : > { %2655 = vmatprep.mubr.f32.mxu0 %v3202_v38 }
  0x40   : > { %2656 = vmatmul.mubr.f32.gmra.mrb[8].mxu0 %v3207_v39 }
  0x41   : > { %2658 = vmatprep.mubr.f32.mxu0 %v3210_v40 }
  0x44   : > { %2659 = vmatmul.mubr.f32.gmra.mrb[10].mxu0 %v3215_v41 }
  0x45   : > { %2661 = vmatprep.mubr.f32.mxu0 %v3218_v42 }
  0x48   : > { %2662 = vmatmul.mubr.f32.gmra.mrb[12].mxu0 %v3223_v43 }
  0x49   : > { %2664 = vmatprep.mubr.f32.mxu0 %v3226_v44 }
  0x4c   : > { %2665 = vmatmul.mubr.f32.gmra.mrb[14].mxu0 %v3231_v45 }
  0x4d   : > { %2667 = vmatprep.mubr.f32.mxu0 %v3234_v46 }
  0x50   : > { %2668 = vmatmul.mubr.f32.gmra.mrb[16].mxu0 %v3239_v47 }
  0x51   : > { %2670 = vmatprep.mubr.f32.mxu0 %v3242_v48 }
  0x54   : > { %2671 = vmatmul.mubr.f32.gmra.mrb[18].mxu0 %v3247_v49 }
  0x55   : > { %2673 = vmatprep.mubr.f32.mxu0 %v3250_v50 }
  0x58   : > { %2674 = vmatmul.mubr.f32.gmra.mrb[20].mxu0 %v3255_v51 }
  0x59   : > { %2676 = vmatprep.mubr.f32.mxu0 %v3258_v52 }
  0x5c   : > { %2677 = vmatmul.mubr.f32.gmra.mrb[22].mxu0 %v3263_v53 }
  0x5d   : > { %2679 = vmatprep.mubr.f32.mxu0 %v3266_v54 }
  0x60   : > { %2680 = vmatmul.mubr.f32.gmra.mrb[24].mxu0 %v3271_v55 }
  0x61   : > { %2682 = vmatprep.mubr.f32.mxu0 %v3274_v56 }
  0x64   : > { %2683 = vmatmul.mubr.f32.gmra.mrb[26].mxu0 %v3279_v57 }
  0x65   : > { %2685 = vmatprep.mubr.f32.mxu0 %v3282_v58 }
  0x68   : > { %2686 = vmatmul.mubr.f32.gmra.mrb[28].mxu0 %v3287_v59 }
  0x69   : > { %2688 = vmatprep.mubr.f32.mxu0 %v3290_v60 }
  0x6c   : > { %2689 = vmatmul.mubr.f32.gmra.mrb[30].mxu0 %v3295_v61 }
 0x103   : > { %v2645_v63 = vpop.f32.mrb[0].mxu0 }
 0x104   : > { %v271_v0 = vpop.f32.mrb[1].mxu0  ;;  %v277_v2 = vadd.f32 %v2645_v63, %v3301_v62 }
 0x105   : > { %v272_v1 = vadd.f32 %v271_v0, %v3301_v62 }
 0x107   : > { %v2648_v3 = vpop.f32.mrb[2].mxu0  ;;  %2699 = vmatprep.mubr.msk.f32.mxu0 %vm430_vm0, %v272_v1 }
 0x108   : > { %v287_v4 = vadd.f32 %v2648_v3, %v3301_v62  ;;  %v281_v5 = vpop.f32.mrb[3].mxu0  ;;  %2700 = vmatmul.mubr.msk.f32.vlgmr.msra.gmra.mrb[32].mxu0 %vm430_vm0, %v277_v2 }
 0x109   : > { %v282_v6 = vadd.f32 %v281_v5, %v3301_v62 }
 0x10b   : > { %v2651_v7 = vpop.f32.mrb[4].mxu0  ;;  %2702 = vmatprep.mubr.msk.f32.mxu0 %vm430_vm0, %v282_v6 }
 0x10c   : > { %v297_v8 = vadd.f32 %v2651_v7, %v3301_v62  ;;  %v291_v9 = vpop.f32.mrb[5].mxu0  ;;  %2703 = vmatmul.mubr.msk.f32.gmra.mrb[34].mxu0 %vm430_vm0, %v287_v4 }
 0x10d   : > { %v292_v10 = vadd.f32 %v291_v9, %v3301_v62 }
 0x10f   : > { %v2654_v11 = vpop.f32.mrb[6].mxu0  ;;  %2705 = vmatprep.mubr.msk.f32.mxu0 %vm430_vm0, %v292_v10 }
 0x110   : > { %v307_v12 = vadd.f32 %v2654_v11, %v3301_v62  ;;  %v301_v13 = vpop.f32.mrb[7].mxu0  ;;  %2706 = vmatmul.mubr.msk.f32.gmra.mrb[36].mxu0 %vm430_vm0, %v297_v8 }
 0x111   : > { %v302_v14 = vadd.f32 %v301_v13, %v3301_v62 }
 0x113   : > { %v2657_v15 = vpop.f32.mrb[8].mxu0  ;;  %2708 = vmatprep.mubr.msk.f32.mxu0 %vm430_vm0, %v302_v14 }
 0x114   : > { %v317_v16 = vadd.f32 %v2657_v15, %v3301_v62  ;;  %v311_v17 = vpop.f32.mrb[9].mxu0  ;;  %2709 = vmatmul.mubr.msk.f32.gmra.mrb[38].mxu0 %vm430_vm0, %v307_v12 }
 0x115   : > { %v312_v18 = vadd.f32 %v311_v17, %v3301_v62 }
 0x117   : > { %v2660_v19 = vpop.f32.mrb[10].mxu0  ;;  %2711 = vmatprep.mubr.msk.f32.mxu0 %vm430_vm0, %v312_v18 }
 0x118   : > { %v327_v20 = vadd.f32 %v2660_v19, %v3301_v62  ;;  %v321_v21 = vpop.f32.mrb[11].mxu0  ;;  %2712 = vmatmul.mubr.msk.f32.gmra.mrb[40].mxu0 %vm430_vm0, %v317_v16 }
 0x119   : > { %v322_v22 = vadd.f32 %v321_v21, %v3301_v62 }
 0x11b   : > { %v2663_v23 = vpop.f32.mrb[12].mxu0  ;;  %2714 = vmatprep.mubr.msk.f32.mxu0 %vm430_vm0, %v322_v22 }
 0x11c   : > { %v337_v24 = vadd.f32 %v2663_v23, %v3301_v62  ;;  %v331_v25 = vpop.f32.mrb[13].mxu0  ;;  %2715 = vmatmul.mubr.msk.f32.gmra.mrb[42].mxu0 %vm430_vm0, %v327_v20 }
 0x11d   : > { %v332_v26 = vadd.f32 %v331_v25, %v3301_v62 }
 0x11f   : > { %v2666_v27 = vpop.f32.mrb[14].mxu0  ;;  %2717 = vmatprep.mubr.msk.f32.mxu0 %vm430_vm0, %v332_v26 }
 0x120   : > { %v347_v28 = vadd.f32 %v2666_v27, %v3301_v62  ;;  %v341_v29 = vpop.f32.mrb[15].mxu0  ;;  %2718 = vmatmul.mubr.msk.f32.gmra.mrb[44].mxu0 %vm430_vm0, %v337_v24 }
 0x121   : > { %v342_v30 = vadd.f32 %v341_v29, %v3301_v62 }
 0x123   : > { %v2669_v63 = vpop.f32.mrb[16].mxu0  ;;  %2720 = vmatprep.mubr.msk.f32.mxu0 %vm430_vm0, %v342_v30 }
 0x124   : > { %v357_v0 = vadd.f32 %v2669_v63, %v3301_v62  ;;  %v351_v1 = vpop.f32.mrb[17].mxu0  ;;  %2721 = vmatmul.mubr.msk.f32.gmra.mrb[46].mxu0 %vm430_vm0, %v347_v28  ;;  %v3370_v63 = vld [vmem:[%s4702_s1 + $0x141] ss:$0 sm:$0xff] }
 0x125   : > { %v352_v2 = vadd.f32 %v351_v1, %v3301_v62 }
 0x127   : > { %v2672_v3 = vpop.f32.mrb[18].mxu0  ;;  %2723 = vmatprep.mubr.msk.f32.mxu0 %vm430_vm0, %v352_v2 }
 0x128   : > { %v367_v4 = vadd.f32 %v2672_v3, %v3301_v62  ;;  %v361_v5 = vpop.f32.mrb[19].mxu0  ;;  %2724 = vmatmul.mubr.msk.f32.gmra.mrb[48].mxu0 %vm430_vm0, %v357_v0 }
 0x129   : > { %v362_v6 = vadd.f32 %v361_v5, %v3301_v62 }
 0x12b   : > { %v2675_v7 = vpop.f32.mrb[20].mxu0  ;;  %2726 = vmatprep.mubr.msk.f32.mxu0 %vm430_vm0, %v362_v6 }
 0x12c   : > { %v377_v8 = vadd.f32 %v2675_v7, %v3301_v62  ;;  %v371_v9 = vpop.f32.mrb[21].mxu0  ;;  %2727 = vmatmul.mubr.msk.f32.gmra.mrb[50].mxu0 %vm430_vm0, %v367_v4 }
 0x12d   : > { %v372_v10 = vadd.f32 %v371_v9, %v3301_v62 }
 0x12f   : > { %2729 = vmatprep.mubr.msk.f32.mxu0 %vm430_vm0, %v372_v10  ;;  %v2678_v11 = vpop.f32.mrb[22].mxu0 }
 0x130   : > { %v387_v12 = vadd.f32 %v2678_v11, %v3301_v62  ;;  %2730 = vmatmul.mubr.msk.f32.gmra.mrb[52].mxu0 %vm430_vm0, %v377_v8  ;;  %v381_v13 = vpop.f32.mrb[23].mxu0 }
 0x131   : > { %v382_v14 = vadd.f32 %v381_v13, %v3301_v62 }
 0x133   : > { %2732 = vmatprep.mubr.msk.f32.mxu0 %vm430_vm0, %v382_v14  ;;  %v2681_v15 = vpop.f32.mrb[24].mxu0 }
 0x134   : > { %2733 = vmatmul.mubr.msk.f32.gmra.mrb[54].mxu0 %vm430_vm0, %v387_v12  ;;  %v397_v16 = vadd.f32 %v2681_v15, %v3301_v62  ;;  %v391_v17 = vpop.f32.mrb[25].mxu0 }
 0x135   : > { %v392_v18 = vadd.f32 %v391_v17, %v3301_v62 }
 0x137   : > { %2735 = vmatprep.mubr.msk.f32.mxu0 %vm430_vm0, %v392_v18  ;;  %v2684_v19 = vpop.f32.mrb[26].mxu0 }
 0x138   : > { %2736 = vmatmul.mubr.msk.f32.gmra.mrb[56].mxu0 %vm430_vm0, %v397_v16  ;;  %v407_v20 = vadd.f32 %v2684_v19, %v3301_v62  ;;  %v401_v21 = vpop.f32.mrb[27].mxu0 }
 0x139   : > { %v402_v22 = vadd.f32 %v401_v21, %v3301_v62 }
 0x13b   : > { %2738 = vmatprep.mubr.msk.f32.mxu1 %vm430_vm0, %v402_v22  ;;  %v2687_v23 = vpop.f32.mrb[28].mxu0 }
 0x13c   : > { %2739 = vmatmul.mubr.msk.f32.vlgmr.msra.gmra.mrb[0].mxu1 %vm430_vm0, %v407_v20  ;;  %v417_v24 = vadd.f32 %v2687_v23, %v3301_v62  ;;  %v411_v25 = vpop.f32.mrb[29].mxu0 }
 0x13d   : > { %v412_v26 = vadd.f32 %v411_v25, %v3301_v62 }
 0x13f   : > { %2741 = vmatprep.mubr.msk.f32.mxu1 %vm430_vm0, %v412_v26  ;;  %v2690_v27 = vpop.f32.mrb[30].mxu0 }
 0x140   : > { %2742 = vmatmul.mubr.msk.f32.gmra.mrb[2].mxu1 %vm430_vm0, %v417_v24  ;;  %v427_v28 = vadd.f32 %v2690_v27, %v3301_v62  ;;  %v421_v29 = vpop.f32.mrb[31].mxu0 }
 0x141   : > { %v422_v30 = vadd.f32 %v421_v29, %v3301_v62 }
 0x143   : > { %2744 = vmatprep.mubr.msk.f32.mxu1 %vm430_vm0, %v422_v30 }
 0x144   : > { %2745 = vmatmul.mubr.msk.f32.gmra.mrb[4].mxu1 %vm430_vm0, %v427_v28 }
 0x1db   : > { %v2701_v0 = vpop.f32.mrb[32].mxu0 }
 0x1dc   : > { %v3373_v1 = vadd.f32 %v2701_v0, %v3370_v63  ;;  %v593_v2 = vpop.f32.mrb[33].mxu0 }
 0x1dd   : > { %v3376_v3 = vadd.f32 %v593_v2, %v3370_v63 }
 0x1de   : > { %v756_v62 = vsel %vm752_vm1, %v3373_v1, -inf }
 0x1df   : > { %757 = vmax.xlane.f32.xlu0 %v756_v62  ;;  %v2704_v4 = vpop.f32.mrb[34].mxu0  ;;  %v753_v9 = vsel %vm752_vm1, %v3376_v3, -inf }
 0x1e0   : > { %v3381_v5 = vadd.f32 %v2704_v4, %v3370_v63  ;;  %v603_v6 = vpop.f32.mrb[35].mxu0 }
 0x1e1   : > { %v3384_v7 = vadd.f32 %v603_v6, %v3370_v63 }
 0x1e2   : > { %v762_v8 = vsel %vm752_vm1, %v3381_v5, -inf }
 0x1e3   : > { %763 = vmax.xlane.f32.xlu1 %v762_v8  ;;  %v2707_v10 = vpop.f32.mrb[36].mxu0  ;;  %754 = vmax.xlane.f32.xlu0 %v753_v9  ;;  %v759_v13 = vsel %vm752_vm1, %v3384_v7, -inf }
 0x1e4   : > { %v3391_v11 = vadd.f32 %v2707_v10, %v3370_v63  ;;  %v613_v12 = vpop.f32.mrb[37].mxu0 }
 0x1e5   : > { %v3396_v14 = vadd.f32 %v613_v12, %v3370_v63 }
 0x1e6   : > { %v768_v19 = vsel %vm752_vm1, %v3391_v11, -inf }
 0x1e7   : > { %v2710_v15 = vpop.f32.mrb[38].mxu0  ;;  %760 = vmax.xlane.f32.xlu1 %v759_v13  ;;  %v765_v16 = vsel %vm752_vm1, %v3396_v14, -inf }
 0x1e8   : > { %v3401_v17 = vadd.f32 %v2710_v15, %v3370_v63  ;;  %v623_v18 = vpop.f32.mrb[39].mxu0  ;;  %766 = vmax.xlane.f32.xlu0 %v765_v16 }
 0x1e9   : > { %v3406_v20 = vadd.f32 %v623_v18, %v3370_v63 }
 0x1ea   : > { %v774_v25 = vsel %vm752_vm1, %v3401_v17, -inf }
 0x1eb   : > { %v2713_v21 = vpop.f32.mrb[40].mxu0  ;;  %769 = vmax.xlane.f32.xlu1 %v768_v19  ;;  %v771_v22 = vsel %vm752_vm1, %v3406_v20, -inf }
 0x1ec   : > { %v3411_v23 = vadd.f32 %v2713_v21, %v3370_v63  ;;  %v633_v24 = vpop.f32.mrb[41].mxu0  ;;  %772 = vmax.xlane.f32.xlu0 %v771_v22 }
 0x1ed   : > { %v3416_v26 = vadd.f32 %v633_v24, %v3370_v63 }
 0x1ee   : > { %v780_v0 = vsel %vm752_vm1, %v3411_v23, -inf }
 0x1ef   : > { %v2716_v27 = vpop.f32.mrb[42].mxu0  ;;  %775 = vmax.xlane.f32.xlu1 %v774_v25  ;;  %v777_v28 = vsel %vm752_vm1, %v3416_v26, -inf }
 0x1f0   : > { %v3421_v29 = vadd.f32 %v2716_v27, %v3370_v63  ;;  %v643_v30 = vpop.f32.mrb[43].mxu0  ;;  %778 = vmax.xlane.f32.xlu0 %v777_v28 }
 0x1f1   : > { %v3426_v2 = vadd.f32 %v643_v30, %v3370_v63 }
 0x1f2   : > { %v786_v9 = vsel %vm752_vm1, %v3421_v29, -inf }
 0x1f3   : > { %v2719_v62 = vpop.f32.mrb[44].mxu0  ;;  %781 = vmax.xlane.f32.xlu1 %v780_v0  ;;  %v783_v4 = vsel %vm752_vm1, %v3426_v2, -inf }
 0x1f4   : > { %v3431_v6 = vadd.f32 %v2719_v62, %v3370_v63  ;;  %v653_v8 = vpop.f32.mrb[45].mxu0  ;;  %784 = vmax.xlane.f32.xlu0 %v783_v4 }
 0x1f5   : > { %v3436_v10 = vadd.f32 %v653_v8, %v3370_v63 }
 0x1f6   : > { %v792_v18 = vsel %vm752_vm1, %v3431_v6, -inf }
 0x1f7   : > { %v2722_v12 = vpop.f32.mrb[46].mxu0  ;;  %787 = vmax.xlane.f32.xlu1 %v786_v9  ;;  %v789_v13 = vsel %vm752_vm1, %v3436_v10, -inf }
 0x1f8   : > { %v3441_v15 = vadd.f32 %v2722_v12, %v3370_v63  ;;  %v663_v16 = vpop.f32.mrb[47].mxu0  ;;  %790 = vmax.xlane.f32.xlu0 %v789_v13 }
 0x1f9   : > { %v3446_v19 = vadd.f32 %v663_v16, %v3370_v63 }
 0x1fa   : > { %v798_v27 = vsel %vm752_vm1, %v3441_v15, -inf }
 0x1fb   : > { %v2725_v21 = vpop.f32.mrb[48].mxu0  ;;  %793 = vmax.xlane.f32.xlu1 %v792_v18  ;;  %v795_v22 = vsel %vm752_vm1, %v3446_v19, -inf }
 0x1fc   : > { %v3451_v24 = vadd.f32 %v2725_v21, %v3370_v63  ;;  %v673_v25 = vpop.f32.mrb[49].mxu0  ;;  %796 = vmax.xlane.f32.xlu0 %v795_v22 }
 0x1fd   : > { %v3456_v28 = vadd.f32 %v673_v25, %v3370_v63 }
 0x1fe   : > { %v804_v8 = vsel %vm752_vm1, %v3451_v24, -inf }
 0x1ff   : > { %v2728_v30 = vpop.f32.mrb[50].mxu0  ;;  %799 = vmax.xlane.f32.xlu1 %v798_v27  ;;  %v801_v0 = vsel %vm752_vm1, %v3456_v28, -inf }
 0x200   : > { %v3461_v62 = vadd.f32 %v2728_v30, %v3370_v63  ;;  %v683_v4 = vpop.f32.mrb[51].mxu0  ;;  %802 = vmax.xlane.f32.xlu0 %v801_v0 }
 0x201   : > { %v3466_v9 = vadd.f32 %v683_v4, %v3370_v63 }
 0x202   : > { %v810_v21 = vsel %vm752_vm1, %v3461_v62, -inf }
 0x203   : > { %v2731_v12 = vpop.f32.mrb[52].mxu0  ;;  %805 = vmax.xlane.f32.xlu1 %v804_v8  ;;  %v807_v13 = vsel %vm752_vm1, %v3466_v9, -inf }
 0x204   : > { %v3471_v16 = vadd.f32 %v2731_v12, %v3370_v63  ;;  %v693_v18 = vpop.f32.mrb[53].mxu0  ;;  %808 = vmax.xlane.f32.xlu0 %v807_v13 }
 0x205   : > { %v3476_v22 = vadd.f32 %v693_v18, %v3370_v63 }
 0x206   : > { %v816_v0 = vsel %vm752_vm1, %v3471_v16, -inf }
 0x207   : > { %811 = vmax.xlane.f32.xlu1 %v810_v21  ;;  %v2734_v25 = vpop.f32.mrb[54].mxu0  ;;  %v813_v27 = vsel %vm752_vm1, %v3476_v22, -inf }
 0x208   : > { %v3481_v30 = vadd.f32 %v2734_v25, %v3370_v63  ;;  %814 = vmax.xlane.f32.xlu0 %v813_v27  ;;  %v703_v4 = vpop.f32.mrb[55].mxu0 }
 0x209   : > { %v3486_v8 = vadd.f32 %v703_v4, %v3370_v63 }
 0x20a   : > { %v822_v12 = vsel %vm752_vm1, %v3481_v30, -inf }
 0x20b   : > { %817 = vmax.xlane.f32.xlu1 %v816_v0  ;;  %v2737_v13 = vpop.f32.mrb[56].mxu0  ;;  %v819_v25 = vsel %vm752_vm1, %v3486_v8, -inf }
 0x20c   : > { %823 = vmax.xlane.f32.xlu0 %v822_v12  ;;  %v713_v18 = vpop.f32.mrb[57].mxu0  ;;  %v3491_v21 = vadd.f32 %v2737_v13, %v3370_v63 }
 0x20d   : > { %v3496_v60 = vadd.f32 %v713_v18, %v3370_v63 }
 0x20e   : > { %v828_v4 = vsel %vm752_vm1, %v3491_v21, -inf }
 0x20f   : > { %v2740_v27 = vpop.f32.mrb[0].mxu1 }
 0x210   : > { %820 = vmax.xlane.f32.xlu0 %v819_v25  ;;  %v723_v61 = vpop.f32.mrb[1].mxu1  ;;  %v3507_v58 = vadd.f32 %v2740_v27, %v3370_v63  ;;  %v825_v25 = vsel %vm752_vm1, %v3496_v60, -inf }
 0x211   : > { %v3501_v0 = vadd.f32 %v723_v61, %v3370_v63 }
 0x213   : > { %v2743_v12 = vpop.f32.mrb[2].mxu1  ;;  %v831_v27 = vsel %vm752_vm1, %v3501_v0, -inf }
 0x214   : > { %829 = vmax.xlane.f32.xlu0 %v828_v4  ;;  %v3504_v13 = vadd.f32 %v2743_v12, %v3370_v63  ;;  %v733_v59 = vpop.f32.mrb[3].mxu1  ;;  %v834_v4 = vsel %vm752_vm1, %v3507_v58, -inf }
 0x215   : > { %v3512_v18 = vadd.f32 %v733_v59, %v3370_v63 }
 0x216   : > { %v840_v59 = vsel %vm752_vm1, %v3504_v13, -inf }
 0x217   : > { %v2746_v57 = vpop.f32.mrb[4].mxu1 }
 0x218   : > { %826 = vmax.xlane.f32.xlu0 %v825_v25  ;;  %v3515_v61 = vadd.f32 %v2746_v57, %v3370_v63  ;;  %v743_v56 = vpop.f32.mrb[5].mxu1  ;;  %v837_v57 = vsel %vm752_vm1, %v3512_v18, -inf }
 0x219   : > { %v3520_v12 = vadd.f32 %v743_v56, %v3370_v63 }
 0x21a   : > { %v846_v25 = vsel %vm752_vm1, %v3515_v61, -inf }
 0x21b   : > { %v843_v56 = vsel %vm752_vm1, %v3520_v12, -inf }
 0x21c   : > { %835 = vmax.xlane.f32.xlu0 %v834_v4 }
 0x220   : > { %832 = vmax.xlane.f32.xlu0 %v831_v27 }
 0x224   : > { %841 = vmax.xlane.f32.xlu0 %v840_v59 }
 0x228   : > { %838 = vmax.xlane.f32.xlu0 %v837_v57 }
 0x22c   : > { %847 = vmax.xlane.f32.xlu0 %v846_v25 }
 0x230   : > { %844 = vmax.xlane.f32.xlu0 %v843_v56 }
 0x26c   : > { %v758_v63 = vpop.xlane.xlu0 %757 }
 0x26d   : > { %v850_v4 = vsub.f32 %v3373_v1, %v758_v63 }
 0x26f   : > { %v883_v27 = vmul.f32 1.442695, %v850_v4 }
 0x270   : > { %v764_v55 = vpop.xlane.xlu1 %763  ;;  %v755_v54 = vpop.xlane.xlu0 %754 }
 0x271   : > { %2810 = vpow2.f32 %v883_v27  ;;  %v852_v59 = vsub.f32 %v3381_v5, %v764_v55  ;;  %v849_v53 = vsub.f32 %v3376_v3, %v755_v54 }
 0x273   : > { %v881_v57 = vmul.f32 1.442695, %v849_v53  ;;  %v887_v52 = vmul.f32 1.442695, %v852_v59 }
 0x274   : > { %v761_v51 = vpop.xlane.xlu1 %760 }
 0x275   : > { %v851_v25 = vsub.f32 %v3384_v7, %v761_v51  ;;  %v767_v50 = vpop.xlane.xlu0 %766  ;;  %2812 = vpow2.f32 %v881_v57 }
 0x276   : > { %2814 = vpow2.f32 %v887_v52  ;;  %v853_v55 = vsub.f32 %v3396_v14, %v767_v50 }
 0x277   : > { %v885_v56 = vmul.f32 1.442695, %v851_v25 }
 0x278   : > { %v770_v49 = vpop.xlane.xlu1 %769  ;;  %v889_v52 = vmul.f32 1.442695, %v853_v55 }
 0x279   : > { %v854_v1 = vsub.f32 %v3391_v11, %v770_v49  ;;  %v773_v63 = vpop.xlane.xlu0 %772  ;;  %2816 = vpow2.f32 %v885_v56 }
 0x27a   : > { %v855_v14 = vsub.f32 %v3406_v20, %v773_v63 }
 0x27b   : > { %v3537_v4 = vpop.eup %2810  ;;  %v891_v5 = vmul.f32 1.442695, %v854_v1 }
 0x27c   : > { %v776_v54 = vpop.xlane.xlu1 %775  ;;  %v948_v53 = vsel %vm752_vm1, %v3537_v4, 0.0 }
 0x27d   : > { %949 = vadd.xlane.f32.xlu1 %v948_v53  ;;  %v779_v51 = vpop.xlane.xlu0 %778  ;;  %2818 = vpow2.f32 %v891_v5  ;;  %v856_v7 = vsub.f32 %v3401_v17, %v776_v54  ;;  %v893_v54 = vmul.f32 1.442695, %v855_v14 }
 0x27e   : > { %2820 = vpow2.f32 %v889_v52 }
 0x27f   : > { %v3542_v3 = vpop.eup %2812  ;;  %v895_v57 = vmul.f32 1.442695, %v856_v7 }
 0x280   : > { %v782_v49 = vpop.xlane.xlu1 %781  ;;  %v945_v11 = vsel %vm752_vm1, %v3542_v3, 0.0  ;;  %v3547_v59 = vpop.eup %2814 }
 0x281   : > { %v785_v27 = vpop.xlane.xlu0 %784  ;;  %946 = vadd.xlane.f32.xlu1 %v945_v11  ;;  %v954_v1 = vsel %vm752_vm1, %v3547_v59, 0.0 }
 0x282   : > { %v859_v50 = vsub.f32 %v3426_v2, %v785_v27  ;;  %v858_v2 = vsub.f32 %v3411_v23, %v782_v49  ;;  %v857_v27 = vsub.f32 %v3416_v26, %v779_v51 }
 0x283   : > { %v3553_v55 = vpop.eup %2816 }
 0x284   : > { %v901_v25 = vmul.f32 1.442695, %v859_v50  ;;  %v788_v56 = vpop.xlane.xlu1 %787  ;;  %v951_v20 = vsel %vm752_vm1, %v3553_v55, 0.0 }
 0x285   : > { %v791_v17 = vpop.xlane.xlu0 %790  ;;  %955 = vadd.xlane.f32.xlu1 %v954_v1 }
 0x286   : > { %2822 = vpow2.f32 %v901_v25  ;;  %v861_v5 = vsub.f32 %v3436_v10, %v791_v17  ;;  %v899_v10 = vmul.f32 1.442695, %v858_v2  ;;  %v897_v17 = vmul.f32 1.442695, %v857_v27 }
 0x287   : > { %2824 = vpow2.f32 %v895_v57  ;;  %v3559_v7 = vpop.eup %2818 }
 0x288   : > { %v905_v53 = vmul.f32 1.442695, %v861_v5  ;;  %v794_v52 = vpop.xlane.xlu1 %793  ;;  %v960_v23 = vsel %vm752_vm1, %v3559_v7, 0.0  ;;  %v3565_v14 = vpop.eup %2820 }
 0x289   : > { %v797_v63 = vpop.xlane.xlu0 %796  ;;  %952 = vadd.xlane.f32.xlu1 %v951_v20  ;;  %v957_v51 = vsel %vm752_vm1, %v3565_v14, 0.0 }
 0x28a   : > { %2826 = vpow2.f32 %v905_v53  ;;  %v863_v11 = vsub.f32 %v3446_v19, %v797_v63  ;;  %v860_v19 = vsub.f32 %v3421_v29, %v788_v56  ;;  %v862_v29 = vsub.f32 %v3431_v6, %v794_v52 }
 0x28b   : > { %2828 = vpow2.f32 %v893_v54 }
 0x28c   : > { %v909_v50 = vmul.f32 1.442695, %v863_v11  ;;  %v800_v25 = vpop.xlane.xlu1 %799  ;;  %v903_v20 = vmul.f32 1.442695, %v860_v19  ;;  %v907_v6 = vmul.f32 1.442695, %v862_v29 }
 0x28d   : > { %v803_v49 = vpop.xlane.xlu0 %802  ;;  %961 = vadd.xlane.f32.xlu1 %v960_v23  ;;  %v864_v52 = vsub.f32 %v3441_v15, %v800_v25 }
 0x28e   : > { %2830 = vpow2.f32 %v909_v50  ;;  %v865_v57 = vsub.f32 %v3456_v28, %v803_v49 }
 0x28f   : > { %2832 = vpow2.f32 %v899_v10 }
 0x290   : > { %v3568_v1 = vpop.eup %2822  ;;  %v913_v26 = vmul.f32 1.442695, %v865_v57  ;;  %v806_v63 = vpop.xlane.xlu1 %805 }
 0x291   : > { %v809_v5 = vpop.xlane.xlu0 %808  ;;  %v975_v54 = vsel %vm752_vm1, %v3568_v1, 0.0  ;;  %v3575_v2 = vpop.eup %2824  ;;  %958 = vadd.xlane.f32.xlu1 %v957_v51  ;;  %v866_v15 = vsub.f32 %v3451_v24, %v806_v63 }
 0x292   : > { %2834 = vpow2.f32 %v913_v26  ;;  %v867_v28 = vsub.f32 %v3466_v9, %v809_v5  ;;  %976 = vadd.xlane.f32.xlu0 %v975_v54  ;;  %v966_v11 = vsel %vm752_vm1, %v3575_v2, 0.0  ;;  %v911_v5 = vmul.f32 1.442695, %v864_v52 }
 0x293   : > { %2836 = vpow2.f32 %v897_v17 }
 0x294   : > { %v3578_v53 = vpop.eup %2826  ;;  %v917_v56 = vmul.f32 1.442695, %v867_v28 }
 0x295   : > { %v815_v27 = vpop.xlane.xlu0 %814  ;;  %v981_v10 = vsel %vm752_vm1, %v3578_v53, 0.0  ;;  %v3585_v50 = vpop.eup %2828  ;;  %967 = vadd.xlane.f32.xlu1 %v966_v11 }
 0x296   : > { %2838 = vpow2.f32 %v917_v56  ;;  %v869_v9 = vsub.f32 %v3476_v22, %v815_v27  ;;  %982 = vadd.xlane.f32.xlu0 %v981_v10  ;;  %v963_v57 = vsel %vm752_vm1, %v3585_v50, 0.0  ;;  %v812_v22 = vpop.xlane.xlu1 %811  ;;  %v915_v56 = vmul.f32 1.442695, %v866_v15 }
 0x297   : > { %2840 = vpow2.f32 %v903_v20  ;;  %v868_v11 = vsub.f32 %v3461_v62, %v812_v22 }
 0x298   : > { %v3588_v23 = vpop.eup %2830  ;;  %v921_v49 = vmul.f32 1.442695, %v869_v9 }
 0x299   : > { %v824_v17 = vpop.xlane.xlu0 %823  ;;  %v987_v19 = vsel %vm752_vm1, %v3588_v23, 0.0  ;;  %v3595_v26 = vpop.eup %2832  ;;  %964 = vadd.xlane.f32.xlu1 %v963_v57  ;;  %v919_v52 = vmul.f32 1.442695, %v868_v11 }
 0x29a   : > { %2842 = vpow2.f32 %v921_v49  ;;  %988 = vadd.xlane.f32.xlu0 %v987_v19  ;;  %v972_v25 = vsel %vm752_vm1, %v3595_v26, 0.0  ;;  %v818_v27 = vpop.xlane.xlu1 %817 }
 0x29b   : > { %2844 = vpow2.f32 %v907_v6  ;;  %v870_v49 = vsub.f32 %v3471_v16, %v818_v27 }
 0x29c   : > { %v3597_v51 = vpop.eup %2834  ;;  %2846 = vpow2.f32 %v911_v5 }
 0x29d   : > { %v821_v54 = vpop.xlane.xlu0 %820  ;;  %v993_v28 = vsel %vm752_vm1, %v3597_v51, 0.0  ;;  %v3604_v20 = vpop.eup %2836  ;;  %973 = vadd.xlane.f32.xlu1 %v972_v25  ;;  %2848 = vpow2.f32 %v915_v56  ;;  %v923_v15 = vmul.f32 1.442695, %v870_v49  ;;  %v872_v25 = vsub.f32 %v3481_v30, %v824_v17 }
 0x29e   : > { %994 = vadd.xlane.f32.xlu0 %v993_v28  ;;  %v969_v24 = vsel %vm752_vm1, %v3604_v20, 0.0  ;;  %2850 = vpow2.f32 %v919_v52 }
 0x29f   : > { %v927_v27 = vmul.f32 1.442695, %v872_v25 }
 0x2a0   : > { %v3606_v29 = vpop.eup %2838 }
 0x2a1   : > { %v830_v63 = vpop.xlane.xlu0 %829  ;;  %v999_v10 = vsel %vm752_vm1, %v3606_v29, 0.0  ;;  %v3613_v9 = vpop.eup %2840  ;;  %970 = vadd.xlane.f32.xlu1 %v969_v24  ;;  %v871_v24 = vsub.f32 %v3486_v8, %v821_v54 }
 0x2a2   : > { %1000 = vadd.xlane.f32.xlu0 %v999_v10  ;;  %v978_v62 = vsel %vm752_vm1, %v3613_v9, 0.0  ;;  %v874_v49 = vsub.f32 %v3491_v21, %v830_v63 }
 0x2a3   : > { %v925_v17 = vmul.f32 1.442695, %v871_v24 }
 0x2a4   : > { %v3615_v6 = vpop.eup %2842 }
 0x2a5   : > { %v827_v57 = vpop.xlane.xlu0 %826  ;;  %v1005_v19 = vsel %vm752_vm1, %v3615_v6, 0.0  ;;  %v3622_v22 = vpop.eup %2844  ;;  %979 = vadd.xlane.f32.xlu1 %v978_v62 }
 0x2a6   : > { %v873_v5 = vsub.f32 %v3496_v60, %v827_v57  ;;  %1006 = vadd.xlane.f32.xlu0 %v1005_v19  ;;  %v984_v16 = vsel %vm752_vm1, %v3622_v22, 0.0  ;;  %v3628_v11 = vpop.eup %2846 }
 0x2a7   : > { %v990_v60 = vsel %vm752_vm1, %v3628_v11, 0.0  ;;  %v3633_v52 = vpop.eup %2848 }
 0x2a8   : > { %v929_v28 = vmul.f32 1.442695, %v873_v5  ;;  %v996_v57 = vsel %vm752_vm1, %v3633_v52, 0.0  ;;  %v3639_v5 = vpop.eup %2850 }
 0x2a9   : > { %v836_v56 = vpop.xlane.xlu0 %835  ;;  %985 = vadd.xlane.f32.xlu1 %v984_v16  ;;  %v1002_v21 = vsel %vm752_vm1, %v3639_v5, 0.0 }
 0x2aa   : > { %2852 = vpow2.f32 %v929_v28 }
 0x2ab   : > { %2854 = vpow2.f32 %v923_v15  ;;  %v931_v15 = vmul.f32 1.442695, %v874_v49 }
 0x2ac   : > { %2856 = vpow2.f32 %v927_v27 }
 0x2ad   : > { %v833_v10 = vpop.xlane.xlu0 %832  ;;  %991 = vadd.xlane.f32.xlu1 %v990_v60 }
 0x2ae   : > { %v875_v30 = vsub.f32 %v3501_v0, %v833_v10  ;;  %v876_v0 = vsub.f32 %v3507_v58, %v836_v56 }
 0x2b0   : > { %v933_v62 = vmul.f32 1.442695, %v875_v30  ;;  %v935_v27 = vmul.f32 1.442695, %v876_v0 }
 0x2b1   : > { %v842_v19 = vpop.xlane.xlu0 %841  ;;  %997 = vadd.xlane.f32.xlu1 %v996_v57 }
 0x2b2   : > { %2858 = vpow2.f32 %v933_v62  ;;  %v878_v8 = vsub.f32 %v3504_v13, %v842_v19 }
 0x2b3   : > { %2860 = vpow2.f32 %v925_v17 }
 0x2b4   : > { %v3642_v54 = vpop.eup %2852  ;;  %v939_v25 = vmul.f32 1.442695, %v878_v8 }
 0x2b5   : > { %v839_v63 = vpop.xlane.xlu0 %838  ;;  %v1017_v28 = vsel %vm752_vm1, %v3642_v54, 0.0  ;;  %v3649_v16 = vpop.eup %2854  ;;  %1003 = vadd.xlane.f32.xlu1 %v1002_v21 }
 0x2b6   : > { %2862 = vpow2.f32 %v939_v25  ;;  %v877_v13 = vsub.f32 %v3512_v18, %v839_v63  ;;  %1018 = vadd.xlane.f32.xlu0 %v1017_v28  ;;  %v1008_v58 = vsel %vm752_vm1, %v3649_v16, 0.0  ;;  %v3654_v60 = vpop.eup %2856 }
 0x2b7   : > { %2864 = vpow2.f32 %v931_v15  ;;  %v1014_v18 = vsel %vm752_vm1, %v3654_v60, 0.0 }
 0x2b8   : > { %v937_v24 = vmul.f32 1.442695, %v877_v13 }
 0x2b9   : > { %v848_v56 = vpop.xlane.xlu0 %847  ;;  %1009 = vadd.xlane.f32.xlu1 %v1008_v58 }
 0x2ba   : > { %2866 = vpow2.f32 %v937_v24  ;;  %v880_v10 = vsub.f32 %v3515_v61, %v848_v56 }
 0x2bb   : > { %2868 = vpow2.f32 %v935_v27 }
 0x2bc   : > { %v3657_v30 = vpop.eup %2858  ;;  %v943_v17 = vmul.f32 1.442695, %v880_v10 }
 0x2bd   : > { %v845_v49 = vpop.xlane.xlu0 %844  ;;  %v1023_v62 = vsel %vm752_vm1, %v3657_v30, 0.0  ;;  %v3663_v57 = vpop.eup %2860  ;;  %1015 = vadd.xlane.f32.xlu1 %v1014_v18 }
 0x2be   : > { %2870 = vpow2.f32 %v943_v17  ;;  %v879_v19 = vsub.f32 %v3520_v12, %v845_v49  ;;  %1024 = vadd.xlane.f32.xlu0 %v1023_v62  ;;  %v1011_v15 = vsel %vm752_vm1, %v3663_v57, 0.0 }
 0x2c0   : > { %v3666_v8 = vpop.eup %2862  ;;  %v941_v61 = vmul.f32 1.442695, %v879_v19 }
 0x2c1   : > { %v1032_v0 = vsel %vm752_vm1, %v3666_v8, 0.0  ;;  %v3672_v25 = vpop.eup %2864  ;;  %1012 = vadd.xlane.f32.xlu1 %v1011_v15 }
 0x2c2   : > { %2872 = vpow2.f32 %v941_v61  ;;  %1033 = vadd.xlane.f32.xlu0 %v1032_v0  ;;  %v1020_v12 = vsel %vm752_vm1, %v3672_v25, 0.0 }
 0x2c4   : > { %v3674_v21 = vpop.eup %2866 }
 0x2c5   : > { %v1029_v63 = vsel %vm752_vm1, %v3674_v21, 0.0  ;;  %v3680_v28 = vpop.eup %2868  ;;  %1021 = vadd.xlane.f32.xlu1 %v1020_v12 }
 0x2c6   : > { %1030 = vadd.xlane.f32.xlu0 %v1029_v63  ;;  %v1026_v27 = vsel %vm752_vm1, %v3680_v28, 0.0 }
 0x2c8   : > { %v3682_v13 = vpop.eup %2870 }
 0x2c9   : > { %v1038_v24 = vsel %vm752_vm1, %v3682_v13, 0.0  ;;  %1027 = vadd.xlane.f32.xlu1 %v1026_v27 }
 0x2ca   : > { %1039 = vadd.xlane.f32.xlu0 %v1038_v24 }
 0x2cc   : > { %v3688_v58 = vpop.eup %2872 }
 0x2cd   : > { %v1035_v56 = vsel %vm752_vm1, %v3688_v58, 0.0 }
 0x2ce   : > { %1036 = vadd.xlane.f32.xlu1 %v1035_v56 }
 0x30a   : > { %v950_v10 = vpop.xlane.xlu1 %949 }
 0x30b   : > { %2874 = vrcp.f32 %v950_v10 }
 0x30e   : > { %v947_v17 = vpop.xlane.xlu1 %946 }
 0x30f   : > { %2876 = vrcp.f32 %v947_v17 }
 0x312   : > { %v956_v18 = vpop.xlane.xlu1 %955 }
 0x313   : > { %2878 = vrcp.f32 %v956_v18 }
 0x315   : > { %v2875_v49 = vpop.eup %2874 }
 0x316   : > { %v1044_v62 = vmul.f32 %v2875_v49, %v3537_v4  ;;  %v953_v19 = vpop.xlane.xlu1 %952 }
 0x317   : > { %2880 = vrcp.f32 %v953_v19 }
 0x318   : > { %v3693_v61 = vmul.f32 13.0, %v1044_v62 }
 0x319   : > { %v2877_v15 = vpop.eup %2876 }
 0x31a   : > { %1299 = vrot.lane.b32.xlu0 %v3693_v61, %s3075_s8  ;;  %1171 = vrot.lane.b32.xlu1 %v3693_v61, %s3076_s10  ;;  %v962_v0 = vpop.xlane.xlu1 %961  ;;  %v1042_v12 = vmul.f32 %v2877_v15, %v3542_v3 }
 0x31c   : > { %v3700_v63 = vmul.f32 13.0, %v1042_v12 }
 0x31d   : > { %v2879_v27 = vpop.eup %2878 }
 0x31e   : > { %1427 = vrot.lane.b32.xlu0 %v3693_v61, %s3077_s11  ;;  %v959_v4 = vpop.xlane.xlu1 %958  ;;  %1297 = vrot.lane.b32.xlu1 %v3700_v63, %s3075_s8  ;;  %v1048_v3 = vmul.f32 %v2879_v27, %v3547_v59 }
 0x31f   : > { %2882 = vrcp.f32 %v959_v4 }
 0x320   : > { %v3716_v18 = vmul.f32 13.0, %v1048_v3 }
 0x321   : > { %v2881_v24 = vpop.eup %2880 }
 0x322   : > { %1169 = vrot.lane.b32.xlu0 %v3700_v63, %s3076_s10  ;;  %v968_v56 = vpop.xlane.xlu1 %967  ;;  %v1046_v10 = vmul.f32 %v2881_v24, %v3553_v55 }
 0x323   : > { %2884 = vrcp.f32 %v968_v56 }
 0x324   : > { %v3710_v17 = vmul.f32 13.0, %v1046_v10  ;;  %2886 = vrcp.f32 %v962_v0 }
 0x326   : > { %1425 = vrot.lane.b32.xlu0 %v3700_v63, %s3077_s11  ;;  %1301 = vrot.lane.b32.xlu1 %v3710_v17, %s3075_s8  ;;  %v965_v62 = vpop.xlane.xlu1 %964 }
 0x327   : > { %2888 = vrcp.f32 %v965_v62 }
 0x329   : > { %v2883_v49 = vpop.eup %2882 }
 0x32a   : > { %1175 = vrot.lane.b32.xlu0 %v3716_v18, %s3076_s10  ;;  %1429 = vrot.lane.b32.xlu1 %v3710_v17, %s3077_s11  ;;  %v1050_v59 = vmul.f32 %v2883_v49, %v3565_v14  ;;  %v974_v0 = vpop.xlane.xlu1 %973 }
 0x32b   : > { %2890 = vrcp.f32 %v974_v0 }
 0x32c   : > { %v3723_v55 = vmul.f32 13.0, %v1050_v59 }
 0x32d   : > { %v2885_v19 = vpop.eup %2884 }
 0x32e   : > { %1303 = vrot.lane.b32.xlu0 %v3716_v18, %s3075_s8  ;;  %1305 = vrot.lane.b32.xlu1 %v3723_v55, %s3075_s8  ;;  %v2887_v15 = vpop.eup %2886  ;;  %v1056_v12 = vmul.f32 %v2885_v19, %v3575_v2  ;;  %v971_v27 = vpop.xlane.xlu1 %970 }
 0x32f   : > { %v1052_v14 = vmul.f32 %v2887_v15, %v3559_v7  ;;  %2892 = vrcp.f32 %v971_v27 }
 0x330   : > { %v3735_v4 = vmul.f32 13.0, %v1056_v12 }
 0x331   : > { %v3741_v24 = vmul.f32 13.0, %v1052_v14  ;;  %v2889_v2 = vpop.eup %2888 }
 0x332   : > { %1431 = vrot.lane.b32.xlu0 %v3716_v18, %s3077_s11  ;;  %1433 = vrot.lane.b32.xlu1 %v3723_v55, %s3077_s11  ;;  %v980_v7 = vpop.xlane.xlu1 %979  ;;  %v1054_v56 = vmul.f32 %v2889_v2, %v3585_v50  ;;  %v977_v50 = vpop.xlane.xlu0 %976 }
 0x333   : > { %2894 = vrcp.f32 %v980_v7 }
 0x334   : > { %v3752_v10 = vmul.f32 13.0, %v1054_v56  ;;  %2896 = vrcp.f32 %v977_v50 }
 0x335   : > { %v2891_v3 = vpop.eup %2890 }
 0x336   : > { %1173 = vrot.lane.b32.xlu0 %v3710_v17, %s3076_s10  ;;  %1183 = vrot.lane.b32.xlu1 %v3735_v4, %s3076_s10  ;;  %v1060_v49 = vmul.f32 %v2891_v3, %v3595_v26  ;;  %v986_v15 = vpop.xlane.xlu1 %985  ;;  %v983_v14 = vpop.xlane.xlu0 %982 }
 0x337   : > { %2898 = vrcp.f32 %v986_v15 }
 0x338   : > { %v3763_v59 = vmul.f32 13.0, %v1060_v49  ;;  %2900 = vrcp.f32 %v983_v14 }
 0x339   : > { %v2893_v62 = vpop.eup %2892 }
 0x33a   : > { %1179 = vrot.lane.b32.xlu0 %v3741_v24, %s3076_s10  ;;  %1311 = vrot.lane.b32.xlu1 %v3735_v4, %s3075_s8  ;;  %v1058_v26 = vmul.f32 %v2893_v62, %v3604_v20  ;;  %v989_v56 = vpop.xlane.xlu0 %988 }
 0x33c   : > { %v3775_v12 = vmul.f32 13.0, %v1058_v26 }
 0x33d   : > { %v2895_v19 = vpop.eup %2894 }
 0x33e   : > { %1307 = vrot.lane.b32.xlu0 %v3741_v24, %s3075_s8  ;;  %1439 = vrot.lane.b32.xlu1 %v3735_v4, %s3077_s11  ;;  %v1064_v0 = vmul.f32 %v2895_v19, %v3613_v9  ;;  %v2897_v20 = vpop.eup %2896  ;;  %v992_v9 = vpop.xlane.xlu1 %991 }
 0x33f   : > { %v1062_v2 = vmul.f32 %v2897_v20, %v3568_v1  ;;  %2902 = vrcp.f32 %v992_v9  ;;  %v995_v15 = vpop.xlane.xlu0 %994 }
 0x340   : > { %v3777_v27 = vmul.f32 13.0, %v1064_v0  ;;  %2904 = vrcp.f32 %v989_v56 }
 0x341   : > { %v2899_v7 = vpop.eup %2898  ;;  %v3792_v3 = vmul.f32 13.0, %v1062_v2 }
 0x342   : > { %1435 = vrot.lane.b32.xlu0 %v3741_v24, %s3077_s11  ;;  %1309 = vrot.lane.b32.xlu1 %v3752_v10, %s3075_s8  ;;  %v1068_v49 = vmul.f32 %v2899_v7, %v3622_v22  ;;  %v2901_v50 = vpop.eup %2900  ;;  %v998_v62 = vpop.xlane.xlu1 %997 }
 0x343   : > { %v1066_v19 = vmul.f32 %v2901_v50, %v3578_v53  ;;  %2906 = vrcp.f32 %v998_v62  ;;  %v1001_v14 = vpop.xlane.xlu0 %1000 }
 0x344   : > { %v3799_v1 = vmul.f32 13.0, %v1068_v49  ;;  %2908 = vrcp.f32 %v995_v15 }
 0x345   : > { %v3806_v26 = vmul.f32 13.0, %v1066_v19 }
 0x346   : > { %1177 = vrot.lane.b32.xlu0 %v3723_v55, %s3076_s10  ;;  %1437 = vrot.lane.b32.xlu1 %v3752_v10, %s3077_s11  ;;  %v1004_v0 = vpop.xlane.xlu1 %1003 }
 0x347   : > { %v1007_v56 = vpop.xlane.xlu0 %1006  ;;  %2910 = vrcp.f32 %v1004_v0 }
 0x348   : > { %2912 = vrcp.f32 %v1001_v14 }
 0x349   : > { %v2903_v22 = vpop.eup %2902 }
 0x34a   : > { %1181 = vrot.lane.b32.xlu0 %v3752_v10, %s3076_s10  ;;  %1315 = vrot.lane.b32.xlu1 %v3763_v59, %s3075_s8  ;;  %v1072_v53 = vmul.f32 %v2903_v22, %v3628_v11  ;;  %v2905_v20 = vpop.eup %2904  ;;  %v1010_v2 = vpop.xlane.xlu1 %1009 }
 0x34b   : > { %v1070_v7 = vmul.f32 %v2905_v20, %v3588_v23  ;;  %v3826_v50 = vpop.xlane.xlu0 %1018  ;;  %2914 = vrcp.f32 %v1010_v2 }
 0x34c   : > { %v3817_v9 = vmul.f32 13.0, %v1072_v53  ;;  %2916 = vrcp.f32 %v1007_v56 }
 0x34d   : > { %v2907_v11 = vpop.eup %2906  ;;  %v3824_v49 = vmul.f32 13.0, %v1070_v7 }
 0x34e   : > { %1187 = vrot.lane.b32.xlu0 %v3763_v59, %s3076_s10  ;;  %1443 = vrot.lane.b32.xlu1 %v3763_v59, %s3077_s11  ;;  %4785 = vst [vmem:[#allocation33_spill] sm:$0xff] %v3817_v9  ;;  %v1016_v62 = vpop.xlane.xlu1 %1015  ;;  %v1076_v23 = vmul.f32 %v2907_v11, %v3633_v52  ;;  %v2909_v19 = vpop.eup %2908 }
 0x34f   : > { %4786 = vst [vmem:[#allocation34_spill] sm:$0xff] %v3824_v49  ;;  %v3833_v15 = vpop.xlane.xlu0 %1024  ;;  %v1074_v0 = vmul.f32 %v2909_v19, %v3597_v51 }
 0x350   : > { %v3839_v22 = vmul.f32 13.0, %v1076_v23 }
 0x351   : > { %v3848_v20 = vmul.f32 13.0, %v1074_v0  ;;  %v2911_v7 = vpop.eup %2910 }
 0x352   : > { %1185 = vrot.lane.b32.xlu0 %v3775_v12, %s3076_s10  ;;  %1191 = vrot.lane.b32.xlu1 %v3777_v27, %s3076_s10  ;;  %4787 = vst [vmem:[#allocation35_spill] sm:$0xff] %v3839_v22  ;;  %v1013_v53 = vpop.xlane.xlu1 %1012  ;;  %v1080_v51 = vmul.f32 %v2911_v7, %v3639_v5  ;;  %v2913_v11 = vpop.eup %2912 }
 0x353   : > { %v3846_v52 = vpop.xlane.xlu0 %1033  ;;  %4788 = vst [vmem:[#allocation36_spill] sm:$0xff] %v3848_v20  ;;  %v1078_v0 = vmul.f32 %v2913_v11, %v3606_v29  ;;  %2918 = vrcp.f32 %v1013_v53 }
 0x354   : > { %v3861_v19 = vmul.f32 13.0, %v1080_v51  ;;  %2920 = vrcp.f32 %v1016_v62 }
 0x355   : > { %v3870_v2 = vmul.f32 13.0, %v1078_v0  ;;  %v2915_v7 = vpop.eup %2914 }
 0x356   : > { %1313 = vrot.lane.b32.xlu0 %v3775_v12, %s3075_s8  ;;  %1319 = vrot.lane.b32.xlu1 %v3777_v27, %s3075_s8  ;;  %v1022_v14 = vpop.xlane.xlu1 %1021  ;;  %4789 = vst [vmem:[#allocation37_spill] sm:$0xff] %v3861_v19  ;;  %v1084_v56 = vmul.f32 %v2915_v7, %v3649_v16  ;;  %v2917_v0 = vpop.eup %2916 }
 0x357   : > { %v3855_v23 = vpop.xlane.xlu0 %1030  ;;  %4790 = vst [vmem:[#allocation38_spill] sm:$0xff] %v3870_v2  ;;  %2922 = vrcp.f32 %v1022_v14  ;;  %v1082_v7 = vmul.f32 %v2917_v0, %v3615_v6 }
 0x358   : > { %v3889_v47 = vmul.f32 13.0, %v1084_v56  ;;  %2924 = vrcp.f32 %v3826_v50 }
 0x359   : > { %v3907_v62 = vmul.f32 13.0, %v1082_v7 }
 0x35a   : > { %1441 = vrot.lane.b32.xlu0 %v3775_v12, %s3077_s11  ;;  %1447 = vrot.lane.b32.xlu1 %v3777_v27, %s3077_s11  ;;  %v1028_v48 = vpop.xlane.xlu1 %1027  ;;  %4791 = vst [vmem:[#allocation39_spill] sm:$0xff] %v3889_v47 }
 0x35b   : > { %v3868_v5 = vpop.xlane.xlu0 %1039  ;;  %4792 = vst [vmem:[#allocation40_spill] sm:$0xff] %v3907_v62  ;;  %2926 = vrcp.f32 %v1028_v48 }
 0x35c   : > { %2928 = vrcp.f32 %v3833_v15 }
 0x35d   : > { %v2919_v46 = vpop.eup %2918  ;;  %2930 = vrcp.f32 %v3855_v23 }
 0x35e   : > { %1317 = vrot.lane.b32.xlu0 %v3792_v3, %s3075_s8  ;;  %1189 = vrot.lane.b32.xlu1 %v3792_v3, %s3076_s10  ;;  %v3874_v51 = vpop.xlane.xlu1 %1036  ;;  %v1086_v44 = vmul.f32 %v2919_v46, %v3663_v57  ;;  %v2921_v6 = vpop.eup %2920  ;;  %2932 = vrcp.f32 %v3846_v52 }
 0x35f   : > { %v1088_v7 = vmul.f32 %v2921_v6, %v3654_v60  ;;  %2934 = vrcp.f32 %v3868_v5 }
 0x360   : > { %v3911_v14 = vmul.f32 13.0, %v1086_v44  ;;  %2936 = vrcp.f32 %v3874_v51 }
 0x361   : > { %v2923_v0 = vpop.eup %2922  ;;  %v3938_v50 = vmul.f32 13.0, %v1088_v7 }
 0x362   : > { %1195 = vrot.lane.b32.xlu0 %v3799_v1, %s3076_s10  ;;  %1445 = vrot.lane.b32.xlu1 %v3792_v3, %s3077_s11  ;;  %4793 = vst [vmem:[#allocation41_spill] sm:$0xff] %v3911_v14  ;;  %v1092_v41 = vmul.f32 %v2923_v0, %v3672_v25  ;;  %v2925_v60 = vpop.eup %2924 }
 0x363   : > { %4794 = vst [vmem:[#allocation42_spill] sm:$0xff] %v3938_v50  ;;  %v1090_v6 = vmul.f32 %v2925_v60, %v3642_v54 }
 0x364   : > { %v3942_v38 = vmul.f32 13.0, %v1092_v41 }
 0x365   : > { %v2927_v0 = vpop.eup %2926  ;;  %v3969_v37 = vmul.f32 13.0, %v1090_v6 }
 0x366   : > { %1323 = vrot.lane.b32.xlu0 %v3799_v1, %s3075_s8  ;;  %1193 = vrot.lane.b32.xlu1 %v3806_v26, %s3076_s10  ;;  %4795 = vst [vmem:[#allocation43_spill] sm:$0xff] %v3942_v38  ;;  %v1096_v36 = vmul.f32 %v2927_v0, %v3680_v28  ;;  %v2929_v35 = vpop.eup %2928 }
 0x367   : > { %4796 = vst [vmem:[#allocation44_spill] sm:$0xff] %v3969_v37  ;;  %v1094_v60 = vmul.f32 %v2929_v35, %v3657_v30  ;;  %v2931_v33 = vpop.eup %2930 }
 0x368   : > { %v3981_v23 = vmul.f32 13.0, %v1096_v36  ;;  %v2933_v36 = vpop.eup %2932  ;;  %v1098_v32 = vmul.f32 %v2931_v33, %v3674_v21 }
 0x369   : > { %v3992_v52 = vmul.f32 13.0, %v1094_v60  ;;  %v1100_v31 = vmul.f32 %v2933_v36, %v3666_v8 }
 0x36a   : > { %1451 = vrot.lane.b32.xlu0 %v3799_v1, %s3077_s11  ;;  %1321 = vrot.lane.b32.xlu1 %v3806_v26, %s3075_s8  ;;  %4797 = vst [vmem:[#allocation45_spill] sm:$0xff] %v3981_v23  ;;  %v4014_v5 = vmul.f32 13.0, %v1098_v32 }
 0x36b   : > { %4798 = vst [vmem:[#allocation46_spill] sm:$0xff] %v3992_v52  ;;  %v4022_v21 = vmul.f32 13.0, %v1100_v31 }
 0x36c   : > { %4799 = vst [vmem:[#allocation47_spill] sm:$0xff] %v4014_v5 }
 0x36d   : > { %4800 = vst [vmem:[#allocation48_spill] sm:$0xff] %v4022_v21 }
 0x36e   : > { %1199 = vrot.lane.b32.xlu0 %v3817_v9, %s3076_s10  ;;  %1449 = vrot.lane.b32.xlu1 %v3806_v26, %s3077_s11 }
 0x372   : > { %1327 = vrot.lane.b32.xlu0 %v3817_v9, %s3075_s8  ;;  %1197 = vrot.lane.b32.xlu1 %v3824_v49, %s3076_s10 }
 0x376   : > { %1455 = vrot.lane.b32.xlu0 %v3817_v9, %s3077_s11  ;;  %1325 = vrot.lane.b32.xlu1 %v3824_v49, %s3075_s8 }
 0x37a   : > { %1203 = vrot.lane.b32.xlu0 %v3839_v22, %s3076_s10  ;;  %1453 = vrot.lane.b32.xlu1 %v3824_v49, %s3077_s11 }
 0x37e   : > { %1329 = vrot.lane.b32.xlu0 %v3848_v20, %s3075_s8  ;;  %1331 = vrot.lane.b32.xlu1 %v3839_v22, %s3075_s8 }
 0x382   : > { %1457 = vrot.lane.b32.xlu0 %v3848_v20, %s3077_s11  ;;  %1459 = vrot.lane.b32.xlu1 %v3839_v22, %s3077_s11 }
 0x386   : > { %1207 = vrot.lane.b32.xlu0 %v3861_v19, %s3076_s10  ;;  %1201 = vrot.lane.b32.xlu1 %v3848_v20, %s3076_s10 }
 0x38a   : > { %1205 = vrot.lane.b32.xlu0 %v3870_v2, %s3076_s10  ;;  %1335 = vrot.lane.b32.xlu1 %v3861_v19, %s3075_s8 }
 0x38c   : > { %v3878_v29 = vpop.permute.xlu0 %1299  ;;  %v3883_v53 = vpop.permute.xlu1 %1171 }
 0x38d   : > { %v1266_v22 = vmul.f32 %v3883_v53, %v3693_v61 }
 0x38e   : > { %1333 = vrot.lane.b32.xlu0 %v3870_v2, %s3075_s8  ;;  %1463 = vrot.lane.b32.xlu1 %v3861_v19, %s3077_s11 }
 0x390   : > { %v3887_v11 = vpop.permute.xlu0 %1427  ;;  %v3898_v45 = vpop.permute.xlu1 %1297 }
 0x392   : > { %1461 = vrot.lane.b32.xlu0 %v3870_v2, %s3077_s11  ;;  %1339 = vrot.lane.b32.xlu1 %v3889_v47, %s3075_s8 }
 0x394   : > { %v3895_v16 = vpop.permute.xlu0 %1169 }
 0x395   : > { %v1265_v61 = vmul.f32 %v3895_v16, %v3700_v63 }
 0x396   : > { %1211 = vrot.lane.b32.xlu0 %v3889_v47, %s3076_s10  ;;  %1467 = vrot.lane.b32.xlu1 %v3889_v47, %s3077_s11 }
 0x397   : > { %v1393_v63 = vmul.f32 %v3898_v45, %v1265_v61 }
 0x398   : > { %v3905_v56 = vpop.permute.xlu0 %1425  ;;  %v3909_v43 = vpop.permute.xlu1 %1301 }
 0x399   : > { %v4130_v45 = vmul.f32 %v3905_v56, %v1393_v63 }
 0x39a   : > { %1209 = vrot.lane.b32.xlu0 %v3907_v62, %s3076_s10  ;;  %1213 = vrot.lane.b32.xlu1 %v3911_v14, %s3076_s10 }
 0x39c   : > { %v3917_v46 = vpop.permute.xlu0 %1175  ;;  %v3919_v57 = vpop.permute.xlu1 %1429 }
 0x39e   : > { %1337 = vrot.lane.b32.xlu0 %v3907_v62, %s3075_s8  ;;  %1341 = vrot.lane.b32.xlu1 %v3911_v14, %s3075_s8 }
 0x3a0   : > { %v3926_v44 = vpop.permute.xlu0 %1303  ;;  %v3929_v42 = vpop.permute.xlu1 %1305 }
 0x3a2   : > { %1465 = vrot.lane.b32.xlu0 %v3907_v62, %s3077_s11  ;;  %1469 = vrot.lane.b32.xlu1 %v3911_v14, %s3077_s11 }
 0x3a4   : > { %v3936_v40 = vpop.permute.xlu0 %1431  ;;  %v3940_v39 = vpop.permute.xlu1 %1433 }
 0x3a6   : > { %1215 = vrot.lane.b32.xlu0 %v3938_v50, %s3076_s10  ;;  %1219 = vrot.lane.b32.xlu1 %v3942_v38, %s3076_s10 }
 0x3a8   : > { %v3949_v48 = vpop.permute.xlu0 %1173  ;;  %v3951_v25 = vpop.permute.xlu1 %1183 }
 0x3a9   : > { %v1267_v16 = vmul.f32 %v3949_v48, %v3710_v17 }
 0x3aa   : > { %1343 = vrot.lane.b32.xlu0 %v3938_v50, %s3075_s8  ;;  %1347 = vrot.lane.b32.xlu1 %v3942_v38, %s3075_s8 }
 0x3ab   : > { %v1395_v17 = vmul.f32 %v3909_v43, %v1267_v16  ;;  %v1554_v43 = vsel %vm1553_vm2, %v4130_v45, -inf }
 0x3ac   : > { %v3957_v41 = vpop.permute.xlu0 %1179  ;;  %v3960_v15 = vpop.permute.xlu1 %1311 }
 0x3ad   : > { %v1270_v53 = vmul.f32 %v3957_v41, %v3741_v24 }
 0x3ae   : > { %1471 = vrot.lane.b32.xlu0 %v3938_v50, %s3077_s11  ;;  %1475 = vrot.lane.b32.xlu1 %v3942_v38, %s3077_s11 }
 0x3b0   : > { %v3967_v7 = vpop.permute.xlu0 %1307  ;;  %v3972_v34 = vpop.permute.xlu1 %1439 }
 0x3b2   : > { %1217 = vrot.lane.b32.xlu0 %v3969_v37, %s3076_s10  ;;  %1345 = vrot.lane.b32.xlu1 %v3969_v37, %s3075_s8 }
 0x3b4   : > { %v3979_v54 = vpop.permute.xlu0 %1435  ;;  %v3984_v6 = vpop.permute.xlu1 %1309 }
 0x3b6   : > { %1223 = vrot.lane.b32.xlu0 %v3981_v23, %s3076_s10  ;;  %1473 = vrot.lane.b32.xlu1 %v3969_v37, %s3077_s11 }
 0x3b8   : > { %v3990_v28 = vpop.permute.xlu0 %1177  ;;  %v3994_v0 = vpop.permute.xlu1 %1437 }
 0x3b9   : > { %v1269_v48 = vmul.f32 %v3990_v28, %v3723_v55  ;;  %v4149_v55 = vmul.f32 %v3919_v57, %v1395_v17 }
 0x3ba   : > { %1221 = vrot.lane.b32.xlu0 %v3992_v52, %s3076_s10  ;;  %1351 = vrot.lane.b32.xlu1 %v3981_v23, %s3075_s8 }
 0x3bb   : > { %v1397_v56 = vmul.f32 %v3929_v42, %v1269_v48  ;;  %v1272_v42 = vmul.f32 %v3951_v25, %v3735_v4 }
 0x3bc   : > { %v1182_v35 = vpop.permute.xlu0 %1181  ;;  %v4001_v30 = vpop.permute.xlu1 %1315 }
 0x3be   : > { %1349 = vrot.lane.b32.xlu0 %v3992_v52, %s3075_s8  ;;  %1479 = vrot.lane.b32.xlu1 %v3981_v23, %s3077_s11  ;;  %v2935_v23 = vpop.eup %2934 }
 0x3bf   : > { %v2937_v8 = vpop.eup %2936 }
 0x3c0   : > { %v4009_v60 = vpop.permute.xlu0 %1187  ;;  %v4012_v38 = vpop.permute.xlu1 %1443  ;;  %v1102_v37 = vmul.f32 %v2937_v8, %v3688_v58 }
 0x3c2   : > { %1477 = vrot.lane.b32.xlu0 %v3992_v52, %s3077_s11  ;;  %1225 = vrot.lane.b32.xlu1 %v4014_v5, %s3076_s10  ;;  %v1104_v52 = vmul.f32 %v2935_v23, %v3682_v13  ;;  %v4052_v23 = vmul.f32 13.0, %v1102_v37 }
 0x3c4   : > { %v4020_v33 = vpop.permute.xlu0 %1185  ;;  %v4024_v51 = vpop.permute.xlu1 %1191  ;;  %v4044_v62 = vmul.f32 13.0, %v1104_v52  ;;  %4802 = vst [vmem:[#allocation50_spill] sm:$0xff] %v4052_v23 }
 0x3c5   : > { %v1273_v28 = vmul.f32 %v4020_v33, %v3775_v12  ;;  %v1560_v12 = vsel %vm1553_vm2, %v4149_v55, -inf  ;;  %v4170_v33 = vmul.f32 %v3940_v39, %v1397_v56  ;;  %v1276_v4 = vmul.f32 %v4024_v51, %v3777_v27 }
 0x3c6   : > { %1227 = vrot.lane.b32.xlu0 %v4022_v21, %s3076_s10  ;;  %1353 = vrot.lane.b32.xlu1 %v4014_v5, %s3075_s8  ;;  %4801 = vst [vmem:[#allocation49_spill] sm:$0xff] %v4044_v62 }
 0x3c7   : > { %v1566_v27 = vsel %vm1553_vm2, %v4170_v33, -inf }
 0x3c8   : > { %v4030_v32 = vpop.permute.xlu0 %1313  ;;  %v4032_v36 = vpop.permute.xlu1 %1319 }
 0x3c9   : > { %v1401_v57 = vmul.f32 %v4030_v32, %v1273_v28  ;;  %v1404_v32 = vmul.f32 %v4032_v36, %v1276_v4 }
 0x3ca   : > { %1355 = vrot.lane.b32.xlu0 %v4022_v21, %s3075_s8  ;;  %1481 = vrot.lane.b32.xlu1 %v4014_v5, %s3077_s11 }
 0x3cc   : > { %v4039_v31 = vpop.permute.xlu0 %1441  ;;  %v4042_v50 = vpop.permute.xlu1 %1447 }
 0x3cd   : > { %v4176_v25 = vmul.f32 %v4039_v31, %v1401_v57  ;;  %v4192_v51 = vmul.f32 %v4042_v50, %v1404_v32  ;;  %v4811_v32 = vld [vmem:[#allocation49_spill] sm:$0xff] }
 0x3ce   : > { %1483 = vrot.lane.b32.xlu0 %v4022_v21, %s3077_s11  ;;  %1231 = vrot.lane.b32.xlu1 %v4044_v62, %s3076_s10 }
 0x3cf   : > { %v1578_v63 = vsel %vm1553_vm2, %v4176_v25, -inf }
 0x3d0   : > { %v4050_v13 = vpop.permute.xlu0 %1317  ;;  %v4054_v47 = vpop.permute.xlu1 %1189 }
 0x3d2   : > { %1229 = vrot.lane.b32.xlu0 %v4052_v23, %s3076_s10  ;;  %1357 = vrot.lane.b32.xlu1 %v4052_v23, %s3075_s8 }
 0x3d4   : > { %v4060_v58 = vpop.permute.xlu0 %1195  ;;  %v4062_v52 = vpop.permute.xlu1 %1445 }
 0x3d6   : > { %1485 = vrot.lane.b32.xlu1 %v4052_v23, %s3077_s11  ;;  %v1394_v23 = vmul.f32 %v3878_v29, %v1266_v22 }
 0x3d8   : > { %v4066_v8 = vpop.permute.xlu0 %1323  ;;  %v4068_v21 = vpop.permute.xlu1 %1193 }
 0x3d9   : > { %v1277_v31 = vmul.f32 %v4068_v21, %v3806_v26 }
 0x3dc   : > { %v4070_v37 = vpop.permute.xlu0 %1451  ;;  %v4072_v5 = vpop.permute.xlu1 %1321 }
 0x3dd   : > { %4803 = vst [vmem:[#allocation51_spill] sm:$0xff] %v4070_v37  ;;  %v4090_v37 = vmul.f32 %v3887_v11, %v1394_v23  ;;  %v1271_v11 = vmul.f32 %v1182_v35, %v3752_v10  ;;  %v1274_v10 = vmul.f32 %v4009_v60, %v3763_v59  ;;  %v1405_v16 = vmul.f32 %v4072_v5, %v1277_v31 }
 0x3df   : > { %v1399_v24 = vmul.f32 %v3984_v6, %v1271_v11 }
 0x3e0   : > { %v4074_v14 = vpop.permute.xlu0 %1199  ;;  %v4076_v19 = vpop.permute.xlu1 %1449 }
 0x3e1   : > { %4804 = vst [vmem:[#allocation52_spill] sm:$0xff] %v4074_v14  ;;  %4805 = vst [vmem:[#allocation53_spill] sm:$0xff] %v4076_v19  ;;  %v1268_v14 = vmul.f32 %v3917_v46, %v3716_v18  ;;  %v1557_v18 = vsel %vm1553_vm2, %v4090_v37, -inf  ;;  %v4141_v6 = vmul.f32 %v3994_v0, %v1399_v24  ;;  %v4807_v24 = vld [vmem:[#allocation33_spill] sm:$0xff] }
 0x3e3   : > { %v1396_v22 = vmul.f32 %v3926_v44, %v1268_v14  ;;  %v1572_v0 = vsel %vm1553_vm2, %v4141_v6, -inf }
 0x3e4   : > { %v4080_v2 = vpop.permute.xlu0 %1327  ;;  %v4082_v20 = vpop.permute.xlu1 %1197 }
 0x3e5   : > { %v4102_v29 = vmul.f32 %v3936_v40, %v1396_v22  ;;  %v1398_v40 = vmul.f32 %v3967_v7, %v1270_v53  ;;  %v1402_v7 = vmul.f32 %v4001_v30, %v1274_v10  ;;  %v1275_v53 = vmul.f32 %v4054_v47, %v3792_v3 }
 0x3e7   : > { %v4118_v14 = vmul.f32 %v3979_v54, %v1398_v40  ;;  %v1563_v41 = vsel %vm1553_vm2, %v4102_v29, -inf  ;;  %v4158_v61 = vmul.f32 %v4012_v38, %v1402_v7  ;;  %v1400_v38 = vmul.f32 %v3960_v15, %v1272_v42  ;;  %v4810_v7 = vld [vmem:[#allocation34_spill] sm:$0xff] }
 0x3e8   : > { %v4085_v62 = vpop.permute.xlu0 %1455  ;;  %v4087_v49 = vpop.permute.xlu1 %1325  ;;  %v1403_v15 = vmul.f32 %v4050_v13, %v1275_v53  ;;  %v1278_v13 = vmul.f32 %v4060_v58, %v3799_v1  ;;  %v4806_v21 = vld [vmem:[#allocation53_spill] sm:$0xff]  ;;  %v4808_v10 = vld [vmem:[#allocation52_spill] sm:$0xff]  ;;  %v4809_v1 = vld [vmem:[#allocation51_spill] sm:$0xff] }
 0x3e9   : > { %v1569_v59 = vsel %vm1553_vm2, %v4118_v14, -inf  ;;  %v1581_v47 = vsel %vm1553_vm2, %v4158_v61, -inf  ;;  %v4185_v39 = vmul.f32 %v3972_v34, %v1400_v38  ;;  %v4210_v40 = vmul.f32 %v4806_v21, %v1405_v16 }
 0x3ea   : > { %v4201_v36 = vmul.f32 %v4062_v52, %v1403_v15  ;;  %v1406_v26 = vmul.f32 %v4066_v8, %v1278_v13  ;;  %v1587_v52 = vsel %vm1553_vm2, %v4192_v51, -inf }
 0x3eb   : > { %v1575_v50 = vsel %vm1553_vm2, %v4185_v39, -inf  ;;  %v1590_v28 = vsel %vm1553_vm2, %v4210_v40, -inf }
 0x3ec   : > { %v4094_v9 = vpop.permute.xlu0 %1203  ;;  %v4096_v19 = vpop.permute.xlu1 %1453  ;;  %v4219_v5 = vmul.f32 %v4809_v1, %v1406_v26  ;;  %v1584_v8 = vsel %vm1553_vm2, %v4201_v36, -inf  ;;  %v4812_v26 = vld [vmem:[#allocation36_spill] sm:$0xff] }
 0x3f0   : > { %v4107_v23 = vpop.permute.xlu0 %1329  ;;  %v4111_v46 = vpop.permute.xlu1 %1331 }
 0x3f1   : > { %1558 = vmax.xlane.f32.xlu0 %v1557_v18 }
 0x3f4   : > { %v4123_v44 = vpop.permute.xlu0 %1457  ;;  %v4127_v35 = vpop.permute.xlu1 %1459 }
 0x3f5   : > { %1564 = vmax.xlane.f32.xlu0 %v1563_v41  ;;  %v1280_v41 = vmul.f32 %v4808_v10, %v4807_v24 }
 0x3f7   : > { %v1408_v58 = vmul.f32 %v4080_v2, %v1280_v41  ;;  %v1593_v2 = vsel %vm1553_vm2, %v4219_v5, -inf }
 0x3f8   : > { %v4136_v54 = vpop.permute.xlu0 %1207  ;;  %v4143_v60 = vpop.permute.xlu1 %1201 }
 0x3f9   : > { %1570 = vmax.xlane.f32.xlu0 %v1569_v59  ;;  %v1279_v59 = vmul.f32 %v4082_v20, %v4810_v7  ;;  %v4227_v56 = vmul.f32 %v4085_v62, %v1408_v58  ;;  %v1281_v21 = vmul.f32 %v4143_v60, %v4812_v26  ;;  %v4815_v60 = vld [vmem:[#allocation37_spill] sm:$0xff] }
 0x3fa   : > { %1555 = vmax.xlane.f32.xlu1 %v1554_v43 }
 0x3fb   : > { %v1407_v42 = vmul.f32 %v4087_v49, %v1279_v59  ;;  %v1599_v20 = vsel %vm1553_vm2, %v4227_v56, -inf  ;;  %v1409_v10 = vmul.f32 %v4107_v23, %v1281_v21  ;;  %v4817_v21 = vld [vmem:[#allocation39_spill] sm:$0xff] }
 0x3fc   : > { %v4153_v30 = vpop.permute.xlu0 %1205  ;;  %v4162_v22 = vpop.permute.xlu1 %1335 }
 0x3fd   : > { %1573 = vmax.xlane.f32.xlu0 %v1572_v0  ;;  %v4235_v57 = vmul.f32 %v4096_v19, %v1407_v42  ;;  %v4255_v58 = vmul.f32 %v4123_v44, %v1409_v10  ;;  %v4818_v10 = vld [vmem:[#allocation40_spill] sm:$0xff] }
 0x3fe   : > { %1561 = vmax.xlane.f32.xlu1 %v1560_v12 }
 0x3ff   : > { %v1596_v12 = vsel %vm1553_vm2, %v4235_v57, -inf }
 0x400   : > { %v4178_v11 = vpop.permute.xlu0 %1333  ;;  %v4182_v3 = vpop.permute.xlu1 %1463 }
 0x401   : > { %1582 = vmax.xlane.f32.xlu0 %v1581_v47 }
 0x402   : > { %1567 = vmax.xlane.f32.xlu1 %v1566_v27 }
 0x404   : > { %v1462_v18 = vpop.permute.xlu0 %1461  ;;  %v4198_v34 = vpop.permute.xlu1 %1339 }
 0x405   : > { %1579 = vmax.xlane.f32.xlu0 %v1578_v63 }
 0x406   : > { %1576 = vmax.xlane.f32.xlu1 %v1575_v50 }
 0x408   : > { %v1212_v17 = vpop.permute.xlu0 %1211  ;;  %v4216_v48 = vpop.permute.xlu1 %1467 }
 0x409   : > { %1588 = vmax.xlane.f32.xlu0 %v1587_v52  ;;  %v4813_v52 = vld [vmem:[#allocation38_spill] sm:$0xff] }
 0x40a   : > { %1585 = vmax.xlane.f32.xlu1 %v1584_v8  ;;  %v1283_v1 = vmul.f32 %v4153_v30, %v4813_v52  ;;  %v4814_v8 = vld [vmem:[#allocation35_spill] sm:$0xff]  ;;  %v1602_v30 = vsel %vm1553_vm2, %v4255_v58, -inf }
 0x40b   : > { %v1282_v7 = vmul.f32 %v4094_v9, %v4814_v8  ;;  %v4816_v9 = vld [vmem:[#allocation41_spill] sm:$0xff] }
 0x40c   : > { %v1210_v43 = vpop.permute.xlu0 %1209  ;;  %v1214_v0 = vpop.permute.xlu1 %1213 }
 0x40d   : > { %1591 = vmax.xlane.f32.xlu0 %v1590_v28  ;;  %v1411_v28 = vmul.f32 %v4178_v11, %v1283_v1  ;;  %v1410_v42 = vmul.f32 %v4111_v46, %v1282_v7  ;;  %v1287_v26 = vmul.f32 %v1214_v0, %v4816_v9  ;;  %v4819_v0 = vld [vmem:[#allocation42_spill] sm:$0xff] }
 0x40e   : > { %1594 = vmax.xlane.f32.xlu1 %v1593_v2  ;;  %v1284_v2 = vmul.f32 %v4136_v54, %v4815_v60  ;;  %v1286_v54 = vmul.f32 %v1212_v17, %v4817_v21 }
 0x40f   : > { %v4268_v44 = vmul.f32 %v4127_v35, %v1410_v42 }
 0x410   : > { %v1338_v53 = vpop.permute.xlu0 %1337  ;;  %v1342_v62 = vpop.permute.xlu1 %1341  ;;  %v1414_v17 = vmul.f32 %v4198_v34, %v1286_v54 }
 0x411   : > { %1600 = vmax.xlane.f32.xlu0 %v1599_v20  ;;  %v4263_v20 = vmul.f32 %v1462_v18, %v1411_v28  ;;  %v1285_v18 = vmul.f32 %v1210_v43, %v4818_v10  ;;  %v1415_v52 = vmul.f32 %v1342_v62, %v1287_v26  ;;  %v1605_v35 = vsel %vm1553_vm2, %v4268_v44, -inf  ;;  %v4820_v28 = vld [vmem:[#allocation44_spill] sm:$0xff] }
 0x412   : > { %v4297_v34 = vmul.f32 %v4216_v48, %v1414_v17  ;;  %v4822_v48 = vld [vmem:[#allocation46_spill] sm:$0xff] }
 0x413   : > { %v1608_v1 = vsel %vm1553_vm2, %v4263_v20, -inf }
 0x414   : > { %v1466_v38 = vpop.permute.xlu0 %1465  ;;  %v1470_v4 = vpop.permute.xlu1 %1469  ;;  %v1617_v26 = vsel %vm1553_vm2, %v4297_v34, -inf }
 0x415   : > { %1597 = vmax.xlane.f32.xlu0 %v1596_v12  ;;  %v1412_v12 = vmul.f32 %v4162_v22, %v1284_v2  ;;  %v1413_v22 = vmul.f32 %v1338_v53, %v1285_v18  ;;  %v4281_v7 = vmul.f32 %v1470_v4, %v1415_v52  ;;  %v4823_v52 = vld [vmem:[#allocation45_spill] sm:$0xff] }
 0x417   : > { %v4273_v11 = vmul.f32 %v4182_v3, %v1412_v12  ;;  %v4286_v43 = vmul.f32 %v1466_v38, %v1413_v22  ;;  %v1620_v4 = vsel %vm1553_vm2, %v4281_v7, -inf  ;;  %v4821_v38 = vld [vmem:[#allocation43_spill] sm:$0xff] }
 0x418   : > { %v1216_v49 = vpop.permute.xlu0 %1215  ;;  %v1220_v47 = vpop.permute.xlu1 %1219 }
 0x419   : > { %v1288_v3 = vmul.f32 %v1216_v49, %v4819_v0  ;;  %v1611_v60 = vsel %vm1553_vm2, %v4273_v11, -inf  ;;  %v4824_v0 = vld [vmem:[#allocation47_spill] sm:$0xff] }
 0x41c   : > { %v1344_v15 = vpop.permute.xlu0 %1343  ;;  %v1348_v19 = vpop.permute.xlu1 %1347 }
 0x41d   : > { %v1416_v62 = vmul.f32 %v1344_v15, %v1288_v3  ;;  %v1290_v15 = vmul.f32 %v1220_v47, %v4821_v38 }
 0x41f   : > { %1359 = vrot.lane.b32.xlu1 %v4811_v32, %s3075_s8  ;;  %v1418_v9 = vmul.f32 %v1348_v19, %v1290_v15 }
 0x420   : > { %v1472_v27 = vpop.permute.xlu0 %1471  ;;  %v1476_v31 = vpop.permute.xlu1 %1475 }
 0x421   : > { %v4306_v54 = vmul.f32 %v1476_v31, %v1418_v9 }
 0x423   : > { %v1629_v19 = vsel %vm1553_vm2, %v4306_v54, -inf }
 0x424   : > { %v1218_v63 = vpop.permute.xlu0 %1217  ;;  %v1346_v13 = vpop.permute.xlu1 %1345 }
 0x425   : > { %v1289_v42 = vmul.f32 %v1218_v63, %v4820_v28  ;;  %v1614_v63 = vsel %vm1553_vm2, %v4286_v43, -inf }
 0x427   : > { %v1417_v53 = vmul.f32 %v1346_v13, %v1289_v42  ;;  %v4825_v42 = vld [vmem:[#allocation48_spill] sm:$0xff] }
 0x428   : > { %v4245_v16 = vpop.permute.xlu0 %1223  ;;  %v1474_v50 = vpop.permute.xlu1 %1473 }
 0x429   : > { %v4300_v12 = vmul.f32 %v1474_v50, %v1417_v53 }
 0x42b   : > { %1487 = vrot.lane.b32.xlu0 %v4811_v32, %s3077_s11  ;;  %v1626_v47 = vsel %vm1553_vm2, %v4300_v12, -inf }
 0x42c   : > { %v1222_v24 = vpop.permute.xlu0 %1221  ;;  %v4250_v41 = vpop.permute.xlu1 %1351 }
 0x42d   : > { %v1291_v10 = vmul.f32 %v1222_v24, %v4822_v48 }
 0x430   : > { %v1350_v59 = vpop.permute.xlu0 %1349  ;;  %v1480_v23 = vpop.permute.xlu1 %1479 }
 0x431   : > { %v1419_v50 = vmul.f32 %v1350_v59, %v1291_v10 }
 0x434   : > { %v1478_v46 = vpop.permute.xlu0 %1477  ;;  %v1226_v8 = vpop.permute.xlu1 %1225 }
 0x435   : > { %v1293_v3 = vmul.f32 %v1226_v8, %v4824_v0 }
 0x438   : > { %v1228_v2 = vpop.permute.xlu0 %1227  ;;  %v1354_v49 = vpop.permute.xlu1 %1353 }
 0x439   : > { %v1294_v17 = vmul.f32 %v1228_v2, %v4825_v42 }
 0x43c   : > { %v1356_v13 = vpop.permute.xlu0 %1355  ;;  %v1482_v21 = vpop.permute.xlu1 %1481 }
 0x440   : > { %v1484_v18 = vpop.permute.xlu0 %1483  ;;  %v4317_v22 = vpop.permute.xlu1 %1231 }
 0x443   : > { %1603 = vmax.xlane.f32.xlu1 %v1602_v30  ;;  %v4290_v30 = vmul.f32 %v1472_v27, %v1416_v62 }
 0x444   : > { %v1230_v28 = vpop.permute.xlu0 %1229 }
 0x445   : > { %v1623_v27 = vsel %vm1553_vm2, %v4290_v30, -inf }
 0x447   : > { %1609 = vmax.xlane.f32.xlu1 %v1608_v1  ;;  %v1292_v1 = vmul.f32 %v4245_v16, %v4823_v52  ;;  %v1421_v16 = vmul.f32 %v1354_v49, %v1293_v3 }
 0x449   : > { %v1420_v31 = vmul.f32 %v4250_v41, %v1292_v1  ;;  %v4326_v62 = vmul.f32 %v1482_v21, %v1421_v16 }
 0x44a   : > { %1606 = vmax.xlane.f32.xlu0 %v1605_v35  ;;  %v4313_v35 = vmul.f32 %v1478_v46, %v1419_v50  ;;  %v1358_v46 = vpop.permute.xlu1 %1357 }
 0x44b   : > { %1612 = vmax.xlane.f32.xlu1 %v1611_v60  ;;  %v4320_v24 = vmul.f32 %v1480_v23, %v1420_v31  ;;  %v4826_v60 = vld [vmem:[#allocation50_spill] sm:$0xff]  ;;  %v1422_v23 = vmul.f32 %v1356_v13, %v1294_v17 }
 0x44c   : > { %v1632_v59 = vsel %vm1553_vm2, %v4313_v35, -inf  ;;  %v1295_v53 = vmul.f32 %v1230_v28, %v4826_v60 }
 0x44d   : > { %v1635_v41 = vsel %vm1553_vm2, %v4320_v24, -inf }
 0x44e   : > { %1621 = vmax.xlane.f32.xlu0 %v1620_v4  ;;  %v4331_v4 = vmul.f32 %v1484_v18, %v1422_v23  ;;  %v1423_v8 = vmul.f32 %v1358_v46, %v1295_v53  ;;  %v1486_v38 = vpop.permute.xlu1 %1485 }
 0x44f   : > { %1615 = vmax.xlane.f32.xlu1 %v1614_v63  ;;  %v1638_v63 = vsel %vm1553_vm2, %v4326_v62, -inf }
 0x450   : > { %v4335_v49 = vmul.f32 %v1486_v38, %v1423_v8  ;;  %v1641_v2 = vsel %vm1553_vm2, %v4331_v4, -inf }
 0x452   : > { %1624 = vmax.xlane.f32.xlu0 %v1623_v27  ;;  %v1644_v15 = vsel %vm1553_vm2, %v4335_v49, -inf }
 0x453   : > { %1618 = vmax.xlane.f32.xlu1 %v1617_v26 }
 0x456   : > { %1627 = vmax.xlane.f32.xlu0 %v1626_v47 }
 0x45a   : > { %1630 = vmax.xlane.f32.xlu0 %v1629_v19 }
 0x45e   : > { %1633 = vmax.xlane.f32.xlu0 %v1632_v59 }
 0x462   : > { %1636 = vmax.xlane.f32.xlu0 %v1635_v41 }
 0x466   : > { %1639 = vmax.xlane.f32.xlu0 %v1638_v63 }
 0x46a   : > { %1642 = vmax.xlane.f32.xlu0 %v1641_v2 }
 0x46e   : > { %1645 = vmax.xlane.f32.xlu0 %v1644_v15 }
 0x47e   : > { %v1559_v27 = vpop.xlane.xlu0 %1558 }
 0x47f   : > { %v1651_v26 = vsub.f32 %v4090_v37, %v1559_v27 }
 0x481   : > { %v1684_v47 = vmul.f32 1.442695, %v1651_v26 }
 0x482   : > { %v1565_v13 = vpop.xlane.xlu0 %1564 }
 0x483   : > { %v1653_v19 = vsub.f32 %v4102_v29, %v1565_v13  ;;  %v1296_v13 = vmul.f32 %v4317_v22, %v4811_v32 }
 0x485   : > { %v1688_v59 = vmul.f32 1.442695, %v1653_v19 }
 0x486   : > { %v1571_v9 = vpop.xlane.xlu0 %1570 }
 0x487   : > { %v1556_v21 = vpop.xlane.xlu1 %1555 }
 0x488   : > { %v1650_v48 = vsub.f32 %v4130_v45, %v1556_v21 }
 0x48a   : > { %v1574_v10 = vpop.xlane.xlu0 %1573  ;;  %v1682_v50 = vmul.f32 1.442695, %v1650_v48 }
 0x48b   : > { %v1562_v18 = vpop.xlane.xlu1 %1561  ;;  %v1656_v41 = vsub.f32 %v4141_v6, %v1574_v10 }
 0x48c   : > { %2938 = vpow2.f32 %v1682_v50  ;;  %v1652_v52 = vsub.f32 %v4149_v55, %v1562_v18  ;;  %v1655_v55 = vsub.f32 %v4118_v14, %v1571_v9 }
 0x48d   : > { %2940 = vpow2.f32 %v1684_v47 }
 0x48e   : > { %v4344_v1 = vpop.xlane.xlu0 %1582  ;;  %v1686_v31 = vmul.f32 1.442695, %v1652_v52 }
 0x48f   : > { %v1568_v0 = vpop.xlane.xlu1 %1567  ;;  %v1659_v32 = vsub.f32 %v4158_v61, %v4344_v1 }
 0x490   : > { %2942 = vpow2.f32 %v1686_v31  ;;  %v1654_v37 = vsub.f32 %v4170_v33, %v1568_v0  ;;  %v1692_v33 = vmul.f32 1.442695, %v1655_v55  ;;  %v204_v55 = vld [vmem:[%s4702_s1 + $0x168] sm:$0x3] }
 0x491   : > { %2944 = vpow2.f32 %v1688_v59 }
 0x492   : > { %v1580_v3 = vpop.xlane.xlu0 %1579  ;;  %v1690_v46 = vmul.f32 1.442695, %v1654_v37 }
 0x493   : > { %v1577_v45 = vpop.xlane.xlu1 %1576  ;;  %v1658_v21 = vsub.f32 %v4176_v25, %v1580_v3  ;;  %v1700_v3 = vmul.f32 1.442695, %v1659_v32 }
 0x494   : > { %2946 = vpow2.f32 %v1690_v46  ;;  %v1657_v15 = vsub.f32 %v4185_v39, %v1577_v45  ;;  %v202_v45 = vld [vmem:[%s4702_s1 + $0x158] sm:$0xff] }
 0x495   : > { %2948 = vpow2.f32 %v1692_v33  ;;  %v1698_v22 = vmul.f32 1.442695, %v1658_v21 }
 0x496   : > { %v4348_v28 = vpop.xlane.xlu0 %1588  ;;  %v4350_v16 = vpop.eup %2938  ;;  %v1696_v48 = vmul.f32 1.442695, %v1657_v15 }
 0x497   : > { %v1586_v42 = vpop.xlane.xlu1 %1585  ;;  %v1746_v29 = vsel %vm1553_vm2, %v4350_v16, 0.0  ;;  %v4355_v17 = vpop.eup %2940  ;;  %v1661_v61 = vsub.f32 %v4192_v51, %v4348_v28  ;;  %v2787_v51 = vpack.c.bf16 %v204_v55, %v202_v45  ;;  %v201_v28 = vld [vmem:[%s4702_s1 + $0x150] sm:$0xff] }
 0x498   : > { %v1660_v60 = vsub.f32 %v4201_v36, %v1586_v42  ;;  %1747 = vadd.xlane.f32.xlu1 %v1746_v29  ;;  %v1749_v14 = vsel %vm1553_vm2, %v4355_v17, 0.0  ;;  %v1694_v36 = vmul.f32 1.442695, %v1656_v41  ;;  %v203_v42 = vld [vmem:[%s4702_s1 + $0x160] sm:$0x3] }
 0x499   : > { %v1704_v29 = vmul.f32 1.442695, %v1661_v61  ;;  %2789 = vmatprep.subr.msk.bf16.mxu1 %vm2788_vm5, %v2787_v51 }
 0x49a   : > { %v1592_v53 = vpop.xlane.xlu0 %1591  ;;  %v1702_v23 = vmul.f32 1.442695, %v1660_v60  ;;  %v4364_v38 = vpop.eup %2942 }
 0x49b   : > { %v1662_v8 = vsub.f32 %v4210_v40, %v1592_v53  ;;  %v4360_v63 = vpop.xlane.xlu1 %1594  ;;  %v1752_v27 = vsel %vm1553_vm2, %v4364_v38, 0.0  ;;  %v4371_v40 = vpop.eup %2944  ;;  %v2790_v53 = vpack.c.bf16 %v203_v42, %v201_v28 }
 0x49c   : > { %1750 = vadd.xlane.f32.xlu1 %v1749_v14  ;;  %2950 = vpow2.f32 %v1702_v23  ;;  %v1755_v39 = vsel %vm1553_vm2, %v4371_v40, 0.0  ;;  %v1663_v60 = vsub.f32 %v4219_v5, %v4360_v63  ;;  %v3079_v63 = vmov 0.0  }
 0x49d   : > { %v1706_v6 = vmul.f32 1.442695, %v1662_v8  ;;  %2952 = vpow2.f32 %v1694_v36  ;;  %2792 = vmatpush1.bf16.msk.msra.mxu1 %vm2788_vm5, %v2790_v53  ;;  %2073 = vmatprep.mubr.f32.mxu1 %v3079_v63 }
 0x49e   : > { %v4366_v2 = vpop.xlane.xlu0 %1600  ;;  %v4379_v47 = vpop.eup %2946  ;;  %v1708_v14 = vmul.f32 1.442695, %v1663_v60 }
 0x49f   : > { %v1360_v9 = vpop.permute.xlu1 %1359  ;;  %2954 = vpow2.f32 %v1706_v6  ;;  %v1758_v25 = vsel %vm1553_vm2, %v4379_v47, 0.0  ;;  %v1665_v5 = vsub.f32 %v4227_v56, %v4366_v2 }
 0x4a0   : > { %1753 = vadd.xlane.f32.xlu1 %v1752_v27  ;;  %v1424_v50 = vmul.f32 %v1360_v9, %v1296_v13  ;;  %2956 = vpow2.f32 %v1696_v48 }
 0x4a1   : > { %v1712_v27 = vmul.f32 1.442695, %v1665_v5 }
 0x4a2   : > { %v1598_v26 = vpop.xlane.xlu0 %1597 }
 0x4a3   : > { %v1664_v10 = vsub.f32 %v4235_v57, %v1598_v26  ;;  %v4387_v57 = vpop.eup %2948 }
 0x4a4   : > { %1756 = vadd.xlane.f32.xlu1 %v1755_v39  ;;  %v1761_v1 = vsel %vm1553_vm2, %v4387_v57, 0.0 }
 0x4a5   : > { %v1710_v18 = vmul.f32 1.442695, %v1664_v10 }
 0x4a6   : > { %v1488_v52 = vpop.permute.xlu0 %1487  ;;  %v4391_v0 = vpop.eup %2950 }
 0x4a7   : > { %v4383_v19 = vmul.f32 %v1488_v52, %v1424_v50  ;;  %2958 = vpow2.f32 %v1710_v18  ;;  %v4397_v59 = vpop.eup %2952  ;;  %v1776_v37 = vsel %vm1553_vm2, %v4391_v0, 0.0 }
 0x4a8   : > { %1759 = vadd.xlane.f32.xlu1 %v1758_v25  ;;  %2960 = vpow2.f32 %v1698_v22  ;;  %v1764_v33 = vsel %vm1553_vm2, %v4397_v59, 0.0 }
 0x4a9   : > { %v1647_v31 = vsel %vm1553_vm2, %v4383_v19, -inf  ;;  %v4407_v46 = vpop.eup %2954  ;;  %2962 = vpow2.f32 %v1700_v3 }
 0x4aa   : > { %1648 = vmax.xlane.f32.xlu0 %v1647_v31  ;;  %v4419_v41 = vpop.eup %2956  ;;  %v1782_v23 = vsel %vm1553_vm2, %v4407_v46, 0.0  ;;  %2964 = vpow2.f32 %v1704_v29 }
 0x4ab   : > { %v1767_v36 = vsel %vm1553_vm2, %v4419_v41, 0.0  ;;  %2966 = vpow2.f32 %v1708_v14 }
 0x4ac   : > { %1762 = vadd.xlane.f32.xlu1 %v1761_v1  ;;  %2968 = vpow2.f32 %v1712_v27 }
 0x4ae   : > { %1777 = vadd.xlane.f32.xlu0 %v1776_v37 }
 0x4b0   : > { %1765 = vadd.xlane.f32.xlu1 %v1764_v33 }
 0x4b1   : > { %v4423_v8 = vpop.eup %2958 }
 0x4b2   : > { %1783 = vadd.xlane.f32.xlu0 %v1782_v23  ;;  %v4430_v15 = vpop.eup %2960  ;;  %v1788_v6 = vsel %vm1553_vm2, %v4423_v8, 0.0 }
 0x4b3   : > { %v1770_v13 = vsel %vm1553_vm2, %v4430_v15, 0.0  ;;  %v4436_v9 = vpop.eup %2962 }
 0x4b4   : > { %1768 = vadd.xlane.f32.xlu1 %v1767_v36  ;;  %v1773_v56 = vsel %vm1553_vm2, %v4436_v9, 0.0  ;;  %v4440_v2 = vpop.eup %2964 }
 0x4b5   : > { %v1779_v26 = vsel %vm1553_vm2, %v4440_v2, 0.0  ;;  %v4444_v21 = vpop.eup %2966 }
 0x4b6   : > { %1789 = vadd.xlane.f32.xlu0 %v1788_v6  ;;  %v1785_v48 = vsel %vm1553_vm2, %v4444_v21, 0.0  ;;  %v4448_v10 = vpop.eup %2968 }
 0x4b7   : > { %v1791_v39 = vsel %vm1553_vm2, %v4448_v10, 0.0 }
 0x4b8   : > { %1771 = vadd.xlane.f32.xlu1 %v1770_v13 }
 0x4bc   : > { %1774 = vadd.xlane.f32.xlu1 %v1773_v56 }
 0x4c0   : > { %1780 = vadd.xlane.f32.xlu1 %v1779_v26 }
 0x4c4   : > { %1786 = vadd.xlane.f32.xlu1 %v1785_v48 }
 0x4c8   : > { %1792 = vadd.xlane.f32.xlu1 %v1791_v39 }
 0x4d0   : > { %v1604_v50 = vpop.xlane.xlu1 %1603 }
 0x4d1   : > { %v1666_v18 = vsub.f32 %v4255_v58, %v1604_v50 }
 0x4d3   : > { %v1714_v52 = vmul.f32 1.442695, %v1666_v18 }
 0x4d4   : > { %v1610_v32 = vpop.xlane.xlu1 %1609 }
 0x4d5   : > { %2970 = vpow2.f32 %v1714_v52  ;;  %v1668_v22 = vsub.f32 %v4263_v20, %v1610_v32 }
 0x4d7   : > { %v1607_v25 = vpop.xlane.xlu0 %1606  ;;  %v1718_v31 = vmul.f32 1.442695, %v1668_v22 }
 0x4d8   : > { %v1667_v3 = vsub.f32 %v4268_v44, %v1607_v25  ;;  %v1613_v61 = vpop.xlane.xlu1 %1612 }
 0x4d9   : > { %2972 = vpow2.f32 %v1718_v31  ;;  %v1669_v37 = vsub.f32 %v4273_v11, %v1613_v61 }
 0x4da   : > { %v1716_v1 = vmul.f32 1.442695, %v1667_v3 }
 0x4db   : > { %v1622_v45 = vpop.xlane.xlu0 %1621  ;;  %v1720_v55 = vmul.f32 1.442695, %v1669_v37 }
 0x4dc   : > { %2974 = vpow2.f32 %v1716_v1  ;;  %v1672_v51 = vsub.f32 %v4281_v7, %v1622_v45  ;;  %v1616_v58 = vpop.xlane.xlu1 %1615 }
 0x4dd   : > { %2976 = vpow2.f32 %v1720_v55  ;;  %v1670_v28 = vsub.f32 %v4286_v43, %v1616_v58 }
 0x4de   : > { %v1726_v29 = vmul.f32 1.442695, %v1672_v51 }
 0x4df   : > { %v1625_v42 = vpop.xlane.xlu0 %1624  ;;  %v4458_v20 = vpop.eup %2970  ;;  %v1722_v60 = vmul.f32 1.442695, %v1670_v28 }
 0x4e0   : > { %v1673_v44 = vsub.f32 %v4290_v30, %v1625_v42  ;;  %v1619_v53 = vpop.xlane.xlu1 %1618  ;;  %v1794_v11 = vsel %vm1553_vm2, %v4458_v20, 0.0 }
 0x4e1   : > { %2978 = vpow2.f32 %v1722_v60  ;;  %v1671_v33 = vsub.f32 %v4297_v34, %v1619_v53  ;;  %1795 = vadd.xlane.f32.xlu0 %v1794_v11 }
 0x4e2   : > { %v1728_v7 = vmul.f32 1.442695, %v1673_v44  ;;  %2980 = vpow2.f32 %v1726_v29 }
 0x4e3   : > { %v1628_v23 = vpop.xlane.xlu0 %1627  ;;  %v4464_v14 = vpop.eup %2972  ;;  %v1724_v43 = vmul.f32 1.442695, %v1671_v33 }
 0x4e4   : > { %v1674_v5 = vsub.f32 %v4300_v12, %v1628_v23  ;;  %v1800_v36 = vsel %vm1553_vm2, %v4464_v14, 0.0 }
 0x4e5   : > { %2982 = vpow2.f32 %v1724_v43  ;;  %1801 = vadd.xlane.f32.xlu0 %v1800_v36 }
 0x4e6   : > { %v4469_v30 = vpop.eup %2974  ;;  %v1730_v6 = vmul.f32 1.442695, %v1674_v5  ;;  %2984 = vpow2.f32 %v1728_v7 }
 0x4e7   : > { %v1631_v27 = vpop.xlane.xlu0 %1630  ;;  %v1797_v34 = vsel %vm1553_vm2, %v4469_v30, 0.0  ;;  %v4473_v13 = vpop.eup %2976 }
 0x4e8   : > { %2986 = vpow2.f32 %v1730_v6  ;;  %v1675_v56 = vsub.f32 %v4306_v54, %v1631_v27  ;;  %1798 = vadd.xlane.f32.xlu1 %v1797_v34  ;;  %v1803_v48 = vsel %vm1553_vm2, %v4473_v13, 0.0 }
 0x4ea   : > { %v1732_v12 = vmul.f32 1.442695, %v1675_v56 }
 0x4eb   : > { %v1634_v26 = vpop.xlane.xlu0 %1633  ;;  %v4478_v39 = vpop.eup %2978 }
 0x4ec   : > { %2988 = vpow2.f32 %v1732_v12  ;;  %v1676_v50 = vsub.f32 %v4313_v35, %v1634_v26  ;;  %1804 = vadd.xlane.f32.xlu1 %v1803_v48  ;;  %v1806_v18 = vsel %vm1553_vm2, %v4478_v39, 0.0  ;;  %v4483_v52 = vpop.eup %2980 }
 0x4ed   : > { %1807 = vadd.xlane.f32.xlu0 %v1806_v18  ;;  %v1812_v35 = vsel %vm1553_vm2, %v4483_v52, 0.0 }
 0x4ee   : > { %v1734_v32 = vmul.f32 1.442695, %v1676_v50 }
 0x4ef   : > { %v1637_v54 = vpop.xlane.xlu0 %1636  ;;  %v4485_v22 = vpop.eup %2982 }
 0x4f0   : > { %2990 = vpow2.f32 %v1734_v32  ;;  %v1677_v25 = vsub.f32 %v4320_v24, %v1637_v54  ;;  %v4488_v31 = vpop.eup %2984  ;;  %v1809_v3 = vsel %vm1553_vm2, %v4485_v22, 0.0 }
 0x4f1   : > { %1810 = vadd.xlane.f32.xlu1 %v1809_v3  ;;  %1813 = vadd.xlane.f32.xlu0 %v1812_v35  ;;  %v1815_v55 = vsel %vm1553_vm2, %v4488_v31, 0.0 }
 0x4f2   : > { %v4494_v61 = vpop.eup %2986  ;;  %v1736_v1 = vmul.f32 1.442695, %v1677_v25 }
 0x4f3   : > { %v1640_v37 = vpop.xlane.xlu0 %1639  ;;  %v1818_v45 = vsel %vm1553_vm2, %v4494_v61, 0.0 }
 0x4f4   : > { %2992 = vpow2.f32 %v1736_v1  ;;  %v1678_v24 = vsub.f32 %v4326_v62, %v1640_v37 }
 0x4f5   : > { %1816 = vadd.xlane.f32.xlu1 %v1815_v55  ;;  %1819 = vadd.xlane.f32.xlu0 %v1818_v45 }
 0x4f6   : > { %v4501_v51 = vpop.eup %2988  ;;  %v1738_v58 = vmul.f32 1.442695, %v1678_v24 }
 0x4f7   : > { %v1643_v28 = vpop.xlane.xlu0 %1642  ;;  %v1821_v42 = vsel %vm1553_vm2, %v4501_v51, 0.0 }
 0x4f8   : > { %2994 = vpow2.f32 %v1738_v58  ;;  %v1679_v29 = vsub.f32 %v4331_v4, %v1643_v28 }
 0x4f9   : > { %1822 = vadd.xlane.f32.xlu1 %v1821_v42 }
 0x4fa   : > { %v4506_v60 = vpop.eup %2990  ;;  %v1740_v44 = vmul.f32 1.442695, %v1679_v29 }
 0x4fb   : > { %v1646_v62 = vpop.xlane.xlu0 %1645  ;;  %v1824_v53 = vsel %vm1553_vm2, %v4506_v60, 0.0 }
 0x4fc   : > { %2996 = vpow2.f32 %v1740_v44  ;;  %v1680_v11 = vsub.f32 %v4335_v49, %v1646_v62  ;;  %1825 = vadd.xlane.f32.xlu0 %v1824_v53 }
 0x4fe   : > { %v4511_v33 = vpop.eup %2992  ;;  %v1742_v7 = vmul.f32 1.442695, %v1680_v11 }
 0x4ff   : > { %v1827_v23 = vsel %vm1553_vm2, %v4511_v33, 0.0 }
 0x500   : > { %2998 = vpow2.f32 %v1742_v7  ;;  %1828 = vadd.xlane.f32.xlu1 %v1827_v23 }
 0x502   : > { %v4515_v4 = vpop.eup %2994 }
 0x503   : > { %v1830_v43 = vsel %vm1553_vm2, %v4515_v4, 0.0 }
 0x504   : > { %1831 = vadd.xlane.f32.xlu0 %v1830_v43 }
 0x506   : > { %v4519_v5 = vpop.eup %2996 }
 0x507   : > { %v1833_v49 = vsel %vm1553_vm2, %v4519_v5, 0.0 }
 0x508   : > { %1834 = vadd.xlane.f32.xlu1 %v1833_v49 }
 0x50a   : > { %v4523_v36 = vpop.eup %2998 }
 0x50b   : > { %v1836_v6 = vsel %vm1553_vm2, %v4523_v36, 0.0 }
 0x50c   : > { %1837 = vadd.xlane.f32.xlu0 %v1836_v6 }
 0x525   : > { %v1748_v27 = vpop.xlane.xlu1 %1747 }
 0x526   : > { %3000 = vrcp.f32 %v1748_v27 }
 0x529   : > { %v1751_v34 = vpop.xlane.xlu1 %1750 }
 0x52a   : > { %3002 = vrcp.f32 %v1751_v34 }
 0x52d   : > { %v1754_v56 = vpop.xlane.xlu1 %1753 }
 0x52e   : > { %3004 = vrcp.f32 %v1754_v56 }
 0x530   : > { %v3001_v12 = vpop.eup %3000 }
 0x531   : > { %v1843_v26 = vmul.f32 %v3001_v12, %v4350_v16  ;;  %v1757_v48 = vpop.xlane.xlu1 %1756 }
 0x532   : > { %3006 = vrcp.f32 %v1757_v48 }
 0x533   : > { %2493 = vmatmul.mubr.msk.f32.vlgmr.msra.gmra.mrb[6].mxu1 %vm1553_vm2, %v1843_v26 }
 0x534   : > { %v3003_v50 = vpop.eup %3002  ;;  %2079 = vmatprep.mubr.f32.mxu1 %v3079_v63 }
 0x535   : > { %v1760_v18 = vpop.xlane.xlu1 %1759  ;;  %v1845_v32 = vmul.f32 %v3003_v50, %v4355_v17 }
 0x536   : > { %3008 = vrcp.f32 %v1760_v18 }
 0x537   : > { %v1649_v54 = vpop.xlane.xlu0 %1648  ;;  %2494 = vmatmul.mubr.msk.f32.gmra.mrb[8].mxu1 %vm1553_vm2, %v1845_v32 }
 0x538   : > { %v1681_v25 = vsub.f32 %v4383_v19, %v1649_v54  ;;  %v3005_v3 = vpop.eup %3004  ;;  %2085 = vmatprep.mubr.f32.mxu1 %v3079_v63 }
 0x539   : > { %v1763_v35 = vpop.xlane.xlu1 %1762  ;;  %v1847_v1 = vmul.f32 %v3005_v3, %v4364_v38 }
 0x53a   : > { %v1744_v16 = vmul.f32 1.442695, %v1681_v25  ;;  %3010 = vrcp.f32 %v1763_v35 }
 0x53b   : > { %2495 = vmatmul.mubr.msk.f32.gmra.mrb[10].mxu1 %vm1553_vm2, %v1847_v1 }
 0x53c   : > { %3012 = vpow2.f32 %v1744_v16  ;;  %v3007_v37 = vpop.eup %3006  ;;  %2091 = vmatprep.mubr.f32.mxu1 %v3079_v63 }
 0x53d   : > { %v1766_v17 = vpop.xlane.xlu1 %1765  ;;  %v1849_v45 = vmul.f32 %v3007_v37, %v4371_v40 }
 0x53e   : > { %3014 = vrcp.f32 %v1766_v17 }
 0x53f   : > { %2496 = vmatmul.mubr.msk.f32.gmra.mrb[12].mxu1 %vm1553_vm2, %v1849_v45 }
 0x540   : > { %v3009_v19 = vpop.eup %3008  ;;  %2097 = vmatprep.mubr.f32.mxu1 %v3079_v63 }
 0x541   : > { %v1769_v24 = vpop.xlane.xlu1 %1768  ;;  %v1851_v55 = vmul.f32 %v3009_v19, %v4379_v47  ;;  %v1778_v47 = vpop.xlane.xlu0 %1777 }
 0x542   : > { %3016 = vrcp.f32 %v1769_v24 }
 0x543   : > { %2497 = vmatmul.mubr.msk.f32.gmra.mrb[14].mxu1 %vm1553_vm2, %v1851_v55 }
 0x544   : > { %v3011_v38 = vpop.eup %3010  ;;  %2103 = vmatprep.mubr.f32.mxu1 %v3079_v63 }
 0x545   : > { %v1772_v28 = vpop.xlane.xlu1 %1771  ;;  %v1853_v40 = vmul.f32 %v3011_v38, %v4387_v57  ;;  %v1784_v23 = vpop.xlane.xlu0 %1783 }
 0x546   : > { %v4543_v58 = vpop.eup %3012  ;;  %3018 = vrcp.f32 %v1772_v28 }
 0x547   : > { %v1839_v42 = vsel %vm1553_vm2, %v4543_v58, 0.0  ;;  %2498 = vmatmul.mubr.msk.f32.gmra.mrb[16].mxu1 %vm1553_vm2, %v1853_v40 }
 0x548   : > { %1840 = vadd.xlane.f32.xlu1 %v1839_v42  ;;  %v3015_v29 = vpop.eup %3014  ;;  %2109 = vmatprep.mubr.f32.mxu1 %v3079_v63 }
 0x549   : > { %v1775_v44 = vpop.xlane.xlu1 %1774  ;;  %v1855_v62 = vmul.f32 %v3015_v29, %v4397_v59 }
 0x54a   : > { %3020 = vrcp.f32 %v1775_v44 }
 0x54b   : > { %2499 = vmatmul.mubr.msk.f32.gmra.mrb[18].mxu1 %vm1553_vm2, %v1855_v62  ;;  %3022 = vrcp.f32 %v1778_v47 }
 0x54c   : > { %v3017_v53 = vpop.eup %3016  ;;  %2115 = vmatprep.mubr.f32.mxu1 %v3079_v63 }
 0x54d   : > { %v1781_v57 = vpop.xlane.xlu1 %1780  ;;  %v1857_v11 = vmul.f32 %v3017_v53, %v4419_v41  ;;  %v1790_v41 = vpop.xlane.xlu0 %1789 }
 0x54e   : > { %3024 = vrcp.f32 %v1781_v57 }
 0x54f   : > { %2500 = vmatmul.mubr.msk.f32.gmra.mrb[20].mxu1 %vm1553_vm2, %v1857_v11  ;;  %3026 = vrcp.f32 %v1784_v23 }
 0x550   : > { %v3019_v7 = vpop.eup %3018  ;;  %2121 = vmatprep.mubr.f32.mxu1 %v3079_v63 }
 0x551   : > { %v1859_v43 = vmul.f32 %v3019_v7, %v4430_v15  ;;  %v1787_v49 = vpop.xlane.xlu1 %1786 }
 0x552   : > { %3028 = vrcp.f32 %v1787_v49 }
 0x553   : > { %2501 = vmatmul.mubr.msk.f32.gmra.mrb[22].mxu1 %vm1553_vm2, %v1859_v43  ;;  %3030 = vrcp.f32 %v1790_v41 }
 0x554   : > { %v3021_v59 = vpop.eup %3020  ;;  %2127 = vmatprep.mubr.f32.mxu1 %v3079_v63 }
 0x555   : > { %v1861_v6 = vmul.f32 %v3021_v59, %v4436_v9  ;;  %v3023_v27 = vpop.eup %3022  ;;  %v1793_v15 = vpop.xlane.xlu1 %1792 }
 0x556   : > { %v1863_v34 = vmul.f32 %v3023_v27, %v4391_v0  ;;  %3032 = vrcp.f32 %v1793_v15 }
 0x557   : > { %2502 = vmatmul.mubr.msk.f32.gmra.mrb[24].mxu1 %vm1553_vm2, %v1861_v6 }
 0x558   : > { %2133 = vmatprep.mubr.f32.mxu1 %v3079_v63  ;;  %v3025_v56 = vpop.eup %3024 }
 0x559   : > { %v1865_v12 = vmul.f32 %v3025_v56, %v4440_v2  ;;  %v3027_v26 = vpop.eup %3026 }
 0x55a   : > { %v1867_v9 = vmul.f32 %v3027_v26, %v4407_v46 }
 0x55b   : > { %2503 = vmatmul.mubr.msk.f32.gmra.mrb[26].mxu1 %vm1553_vm2, %v1863_v34 }
 0x55c   : > { %2139 = vmatprep.mubr.f32.mxu1 %v3079_v63  ;;  %v3029_v48 = vpop.eup %3028 }
 0x55d   : > { %v1869_v0 = vmul.f32 %v3029_v48, %v4444_v21  ;;  %v3031_v50 = vpop.eup %3030 }
 0x55e   : > { %v1871_v2 = vmul.f32 %v3031_v50, %v4423_v8  ;;  %v4827_v50 = vld [vmem:[#allocation2_spill] sm:$0xff] }
 0x55f   : > { %2504 = vmatmul.mubr.msk.f32.gmra.mrb[28].mxu1 %vm1553_vm2, %v1865_v12 }
 0x560   : > { %2145 = vmatprep.mubr.f32.mxu1 %v3079_v63  ;;  %v3033_v18 = vpop.eup %3032 }
 0x561   : > { %v1873_v46 = vmul.f32 %v3033_v18, %v4448_v10 }
 0x563   : > { %2505 = vmatmul.mubr.msk.f32.gmra.mrb[30].mxu1 %vm1553_vm2, %v1867_v9 }
 0x564   : > { %2151 = vmatprep.mubr.f32.mxu1 %v3079_v63 }
 0x567   : > { %2506 = vmatmul.mubr.msk.f32.gmra.mrb[32].mxu1 %vm1553_vm2, %v1869_v0 }
 0x568   : > { %2157 = vmatprep.mubr.f32.mxu1 %v3079_v63 }
 0x56b   : > { %2507 = vmatmul.mubr.msk.f32.gmra.mrb[34].mxu1 %vm1553_vm2, %v1871_v2 }
 0x56c   : > { %2163 = vmatprep.mubr.f32.mxu1 %v3079_v63 }
 0x56e   : > { %v1796_v32 = vpop.xlane.xlu0 %1795 }
 0x56f   : > { %3034 = vrcp.f32 %v1796_v32  ;;  %2508 = vmatmul.mubr.msk.f32.gmra.mrb[36].mxu1 %vm1553_vm2, %v1873_v46 }
 0x570   : > { %2169 = vmatprep.mubr.f32.mxu1 %v3079_v63 }
 0x572   : > { %v1802_v21 = vpop.xlane.xlu0 %1801 }
 0x575   : > { %v1799_v54 = vpop.xlane.xlu1 %1798 }
 0x576   : > { %3036 = vrcp.f32 %v1799_v54  ;;  %v4828_v54 = vld [vmem:[#allocation3_spill] sm:$0xff] }
 0x577   : > { %3038 = vrcp.f32 %v1802_v21 }
 0x579   : > { %v1805_v25 = vpop.xlane.xlu1 %1804  ;;  %v3035_v3 = vpop.eup %3034 }
 0x57a   : > { %v1875_v8 = vmul.f32 %v3035_v3, %v4458_v20  ;;  %3040 = vrcp.f32 %v1805_v25  ;;  %v1808_v16 = vpop.xlane.xlu0 %1807 }
 0x57b   : > { %3042 = vrcp.f32 %v1808_v16 }
 0x57c   : > { %2509 = vmatmul.mubr.msk.f32.gmra.mrb[38].mxu1 %vm1553_vm2, %v1875_v8 }
 0x57d   : > { %2175 = vmatprep.mubr.f32.mxu1 %v3079_v63 }
 0x57e   : > { %v1811_v35 = vpop.xlane.xlu1 %1810  ;;  %v1814_v17 = vpop.xlane.xlu0 %1813 }
 0x57f   : > { %3044 = vrcp.f32 %v1811_v35  ;;  %v4829_v35 = vld [vmem:[#allocation4_spill] sm:$0xff] }
 0x580   : > { %v3037_v10 = vpop.eup %3036  ;;  %3046 = vrcp.f32 %v1814_v17 }
 0x581   : > { %v1877_v1 = vmul.f32 %v3037_v10, %v4469_v30  ;;  %v3039_v37 = vpop.eup %3038 }
 0x582   : > { %v1879_v20 = vmul.f32 %v3039_v37, %v4464_v14  ;;  %v1817_v19 = vpop.xlane.xlu1 %1816  ;;  %v1820_v30 = vpop.xlane.xlu0 %1819 }
 0x583   : > { %2510 = vmatmul.mubr.msk.f32.gmra.mrb[40].mxu1 %vm1553_vm2, %v1877_v1  ;;  %3048 = vrcp.f32 %v1817_v19  ;;  %v4830_v19 = vld [vmem:[#allocation5_spill] sm:$0xff] }
 0x584   : > { %2181 = vmatprep.mubr.f32.mxu1 %v3079_v63  ;;  %v3041_v45 = vpop.eup %3040  ;;  %3050 = vrcp.f32 %v1820_v30 }
 0x585   : > { %v1881_v24 = vmul.f32 %v3041_v45, %v4473_v13  ;;  %v3043_v55 = vpop.eup %3042 }
 0x586   : > { %v1883_v38 = vmul.f32 %v3043_v55, %v4478_v39  ;;  %v1823_v14 = vpop.xlane.xlu1 %1822 }
 0x587   : > { %2511 = vmatmul.mubr.msk.f32.gmra.mrb[42].mxu1 %vm1553_vm2, %v1879_v20  ;;  %3052 = vrcp.f32 %v1823_v14  ;;  %v4831_v14 = vld [vmem:[#allocation6_spill] sm:$0xff] }
 0x588   : > { %2187 = vmatprep.mubr.f32.mxu1 %v3079_v63 }
 0x589   : > { %v3045_v28 = vpop.eup %3044  ;;  %v1826_v13 = vpop.xlane.xlu0 %1825 }
 0x58a   : > { %v1885_v40 = vmul.f32 %v3045_v28, %v4485_v22  ;;  %v3047_v42 = vpop.eup %3046  ;;  %3054 = vrcp.f32 %v1826_v13 }
 0x58b   : > { %2512 = vmatmul.mubr.msk.f32.gmra.mrb[44].mxu1 %vm1553_vm2, %v1881_v24  ;;  %v1887_v29 = vmul.f32 %v3047_v42, %v4483_v52 }
 0x58c   : > { %2193 = vmatprep.mubr.f32.mxu1 %v3079_v63 }
 0x58d   : > { %v3049_v47 = vpop.eup %3048  ;;  %v1829_v39 = vpop.xlane.xlu1 %1828 }
 0x58e   : > { %v1889_v44 = vmul.f32 %v3049_v47, %v4488_v31  ;;  %v3051_v62 = vpop.eup %3050  ;;  %3056 = vrcp.f32 %v1829_v39  ;;  %v4832_v39 = vld [vmem:[#allocation7_spill] sm:$0xff] }
 0x58f   : > { %2513 = vmatmul.mubr.msk.f32.gmra.mrb[46].mxu1 %vm1553_vm2, %v1883_v38  ;;  %v1891_v53 = vmul.f32 %v3051_v62, %v4494_v61 }
 0x590   : > { %2199 = vmatprep.mubr.f32.mxu1 %v3079_v63 }
 0x591   : > { %v1832_v22 = vpop.xlane.xlu0 %1831  ;;  %v3053_v57 = vpop.eup %3052 }
 0x592   : > { %3058 = vrcp.f32 %v1832_v22  ;;  %v1893_v11 = vmul.f32 %v3053_v57, %v4501_v51 }
 0x593   : > { %2514 = vmatmul.mubr.msk.f32.gmra.mrb[48].mxu1 %vm1553_vm2, %v1885_v40 }
 0x594   : > { %2205 = vmatprep.mubr.f32.mxu1 %v3079_v63  ;;  %v3055_v7 = vpop.eup %3054 }
 0x595   : > { %v1835_v52 = vpop.xlane.xlu1 %1834  ;;  %v1895_v23 = vmul.f32 %v3055_v7, %v4506_v60 }
 0x596   : > { %3060 = vrcp.f32 %v1835_v52  ;;  %v4833_v52 = vld [vmem:[#allocation8_spill] sm:$0xff] }
 0x597   : > { %2515 = vmatmul.mubr.msk.f32.gmra.mrb[50].mxu1 %vm1553_vm2, %v1887_v29 }
 0x598   : > { %2211 = vmatprep.mubr.f32.mxu1 %v3079_v63  ;;  %v3057_v43 = vpop.eup %3056 }
 0x599   : > { %v1838_v31 = vpop.xlane.xlu0 %1837  ;;  %v1897_v61 = vmul.f32 %v3057_v43, %v4511_v33 }
 0x59a   : > { %3062 = vrcp.f32 %v1838_v31 }
 0x59b   : > { %2516 = vmatmul.mubr.msk.f32.gmra.mrb[52].mxu1 %vm1553_vm2, %v1889_v44 }
 0x59c   : > { %2217 = vmatprep.mubr.f32.mxu1 %v3079_v63  ;;  %v3059_v59 = vpop.eup %3058 }
 0x59d   : > { %v1899_v51 = vmul.f32 %v3059_v59, %v4515_v4 }
 0x59f   : > { %2517 = vmatmul.mubr.msk.f32.gmra.mrb[54].mxu1 %vm1553_vm2, %v1891_v53 }
 0x5a0   : > { %2223 = vmatprep.mubr.f32.mxu1 %v3079_v63  ;;  %v3061_v49 = vpop.eup %3060 }
 0x5a1   : > { %v1901_v60 = vmul.f32 %v3061_v49, %v4519_v5 }
 0x5a3   : > { %2518 = vmatmul.mubr.msk.f32.gmra.mrb[56].mxu1 %vm1553_vm2, %v1893_v11 }
 0x5a4   : > { %2229 = vmatprep.mubr.f32.mxu1 %v3079_v63  ;;  %v3063_v6 = vpop.eup %3062 }
 0x5a5   : > { %v1903_v33 = vmul.f32 %v3063_v6, %v4523_v36  ;;  %v3066_v36 = vld [vmem:[%s3141_s7] sm:$0xff] }
 0x5a7   : > { %2519 = vmatmul.mubr.msk.f32.gmra.mrb[58].mxu1 %vm1553_vm2, %v1895_v23 }
 0x5a8   : > { %2235 = vmatprep.mubr.f32.mxu1 %v3079_v63 }
 0x5ab   : > { %2520 = vmatmul.mubr.msk.f32.gmra.mrb[60].mxu1 %vm1553_vm2, %v1897_v61  ;;  %v4834_v61 = vld [vmem:[#allocation9_spill] sm:$0xff] }
 0x5ac   : > { %2241 = vmatprep.mubr.f32.mxu1 %v3079_v63 }
 0x5af   : > { %2521 = vmatmul.mubr.msk.f32.gmra.mrb[62].mxu1 %vm1553_vm2, %v1899_v51 }
 0x5b0   : > { %2247 = vmatprep.mubr.f32.mxu1 %v3079_v63 }
 0x5b3   : > { %2522 = vmatmul.mubr.msk.f32.gmra.mrb[64].mxu1 %vm1553_vm2, %v1901_v60 }
 0x5b4   : > { %2253 = vmatprep.mubr.f32.mxu1 %v3079_v63 }
 0x5b7   : > { %2523 = vmatmul.mubr.msk.f32.gmra.mrb[66].mxu1 %vm1553_vm2, %v1903_v33  ;;  %v4835_v33 = vld [vmem:[#allocation10_spill] sm:$0xff] }
 0x5b8   : > { %2259 = vmatprep.mubr.f32.mxu1 %v3079_v63 }
 0x5d5   : > { %v1841_v4 = vpop.xlane.xlu1 %1840 }
 0x5d6   : > { %3064 = vrcp.f32 %v1841_v4 }
 0x5e0   : > { %v3065_v27 = vpop.eup %3064 }
 0x5e1   : > { %v1905_v41 = vmul.f32 %v3065_v27, %v4543_v58 }
 0x5e3   : > { %2524 = vmatmul.mubr.msk.f32.gmra.mrb[68].mxu1 %vm1553_vm2, %v1905_v41 }
 0x606   : > { %v2075_v5 = vpop.f32.mrb[6].mxu1 }
 0x607   : > { %v2077_v34 = vpop.f32.mrb[7].mxu1 }
 0x608   : > { %v2266_v56 = vmul.f32 %v2077_v34, %v2075_v5 }
 0x60a   : > { %v2298_v15 = vmul.f32 100.0, %v2266_v56  ;;  %v2081_v12 = vpop.f32.mrb[8].mxu1  ;;  %v4836_v56 = vld [vmem:[#allocation11_spill] sm:$0xff] }
 0x60b   : > { %v2083_v63 = vpop.f32.mrb[9].mxu1 }
 0x60c   : > { %v2330_v26 = vmul.f32 %v3066_v36, %v2298_v15  ;;  %v2267_v58 = vmul.f32 %v2083_v63, %v2081_v12 }
 0x60e   : > { %2362 = vst [vmem:[%s4632_s23] sm:$0xff] %v2330_v26  ;;  %v2299_v9 = vmul.f32 100.0, %v2267_v58  ;;  %v2087_v48 = vpop.f32.mrb[10].mxu1  ;;  %v4837_v58 = vld [vmem:[#allocation12_spill] sm:$0xff] }
 0x60f   : > { %v2089_v0 = vpop.f32.mrb[11].mxu1 }
 0x610   : > { %v2331_v2 = vmul.f32 %v2299_v9, %v4827_v50  ;;  %v2268_v18 = vmul.f32 %v2089_v0, %v2087_v48 }
 0x612   : > { %2363 = vst [vmem:[%s4632_s23 + $0x8] sm:$0xff] %v2331_v2  ;;  %v2300_v46 = vmul.f32 100.0, %v2268_v18  ;;  %v2093_v32 = vpop.f32.mrb[12].mxu1  ;;  %v4838_v18 = vld [vmem:[#allocation13_spill] sm:$0xff] }
 0x613   : > { %v2095_v21 = vpop.f32.mrb[13].mxu1 }
 0x614   : > { %v2332_v25 = vmul.f32 %v2300_v46, %v4828_v54  ;;  %v2269_v3 = vmul.f32 %v2095_v21, %v2093_v32 }
 0x616   : > { %2364 = vst [vmem:[%s4632_s23 + $0x10] sm:$0xff] %v2332_v25  ;;  %v2301_v8 = vmul.f32 100.0, %v2269_v3  ;;  %v2099_v16 = vpop.f32.mrb[14].mxu1  ;;  %v4839_v3 = vld [vmem:[#allocation14_spill] sm:$0xff] }
 0x617   : > { %v2101_v10 = vpop.f32.mrb[15].mxu1 }
 0x618   : > { %v2333_v1 = vmul.f32 %v2301_v8, %v4829_v35  ;;  %v2270_v37 = vmul.f32 %v2101_v10, %v2099_v16 }
 0x61a   : > { %2365 = vst [vmem:[%s4632_s23 + $0x18] sm:$0xff] %v2333_v1  ;;  %v2302_v17 = vmul.f32 100.0, %v2270_v37  ;;  %v2105_v20 = vpop.f32.mrb[16].mxu1  ;;  %v4840_v37 = vld [vmem:[#allocation15_spill] sm:$0xff] }
 0x61b   : > { %v2107_v45 = vpop.f32.mrb[17].mxu1 }
 0x61c   : > { %v2334_v24 = vmul.f32 %v2302_v17, %v4830_v19  ;;  %v2271_v55 = vmul.f32 %v2107_v45, %v2105_v20  ;;  %v4841_v19 = vld [vmem:[#allocation16_spill] sm:$0xff] }
 0x61e   : > { %2366 = vst [vmem:[%s4632_s23 + $0x20] sm:$0xff] %v2334_v24  ;;  %v2303_v30 = vmul.f32 100.0, %v2271_v55  ;;  %v2111_v38 = vpop.f32.mrb[18].mxu1 }
 0x61f   : > { %v2113_v28 = vpop.f32.mrb[19].mxu1 }
 0x620   : > { %v2335_v40 = vmul.f32 %v2303_v30, %v4831_v14  ;;  %v2272_v42 = vmul.f32 %v2113_v28, %v2111_v38  ;;  %v4842_v14 = vld [vmem:[#allocation17_spill] sm:$0xff] }
 0x622   : > { %2367 = vst [vmem:[%s4632_s23 + $0x28] sm:$0xff] %v2335_v40  ;;  %v2304_v13 = vmul.f32 100.0, %v2272_v42  ;;  %v2117_v29 = vpop.f32.mrb[20].mxu1 }
 0x623   : > { %v2119_v47 = vpop.f32.mrb[21].mxu1 }
 0x624   : > { %v2336_v44 = vmul.f32 %v2304_v13, %v4832_v39  ;;  %v2273_v62 = vmul.f32 %v2119_v47, %v2117_v29 }
 0x626   : > { %2368 = vst [vmem:[%s4632_s23 + $0x30] sm:$0xff] %v2336_v44  ;;  %v2305_v22 = vmul.f32 100.0, %v2273_v62  ;;  %v2123_v53 = vpop.f32.mrb[22].mxu1  ;;  %v4843_v62 = vld [vmem:[#allocation18_spill] sm:$0xff] }
 0x627   : > { %v2125_v57 = vpop.f32.mrb[23].mxu1 }
 0x628   : > { %v2337_v11 = vmul.f32 %v2305_v22, %v4833_v52  ;;  %v2274_v7 = vmul.f32 %v2125_v57, %v2123_v53 }
 0x62a   : > { %2369 = vst [vmem:[%s4632_s23 + $0x38] sm:$0xff] %v2337_v11  ;;  %v2306_v31 = vmul.f32 100.0, %v2274_v7  ;;  %v2129_v23 = vpop.f32.mrb[24].mxu1  ;;  %v4844_v7 = vld [vmem:[#allocation19_spill] sm:$0xff] }
 0x62b   : > { %v2131_v43 = vpop.f32.mrb[25].mxu1 }
 0x62c   : > { %v2338_v59 = vmul.f32 %v2306_v31, %v4834_v61  ;;  %v2275_v51 = vmul.f32 %v2131_v43, %v2129_v23 }
 0x62e   : > { %2370 = vst [vmem:[%s4632_s23 + $0x40] sm:$0xff] %v2338_v59  ;;  %v2307_v49 = vmul.f32 100.0, %v2275_v51  ;;  %v2135_v60 = vpop.f32.mrb[26].mxu1  ;;  %v4845_v51 = vld [vmem:[#allocation20_spill] sm:$0xff] }
 0x62f   : > { %v2137_v6 = vpop.f32.mrb[27].mxu1 }
 0x630   : > { %v2339_v4 = vmul.f32 %v2307_v49, %v4835_v33  ;;  %v2276_v27 = vmul.f32 %v2137_v6, %v2135_v60 }
 0x632   : > { %2371 = vst [vmem:[%s4632_s23 + $0x48] sm:$0xff] %v2339_v4  ;;  %v2308_v41 = vmul.f32 100.0, %v2276_v27  ;;  %v2141_v5 = vpop.f32.mrb[28].mxu1  ;;  %v4846_v27 = vld [vmem:[#allocation21_spill] sm:$0xff] }
 0x633   : > { %v2143_v34 = vpop.f32.mrb[29].mxu1 }
 0x634   : > { %v2340_v15 = vmul.f32 %v2308_v41, %v4836_v56  ;;  %v2277_v12 = vmul.f32 %v2143_v34, %v2141_v5 }
 0x636   : > { %2372 = vst [vmem:[%s4632_s23 + $0x50] sm:$0xff] %v2340_v15  ;;  %v2309_v63 = vmul.f32 100.0, %v2277_v12  ;;  %v2147_v36 = vpop.f32.mrb[30].mxu1  ;;  %v4847_v12 = vld [vmem:[#allocation22_spill] sm:$0xff] }
 0x637   : > { %v2149_v26 = vpop.f32.mrb[31].mxu1 }
 0x638   : > { %v2341_v9 = vmul.f32 %v2309_v63, %v4837_v58  ;;  %v2278_v48 = vmul.f32 %v2149_v26, %v2147_v36 }
 0x63a   : > { %2373 = vst [vmem:[%s4632_s23 + $0x58] sm:$0xff] %v2341_v9  ;;  %v2310_v0 = vmul.f32 100.0, %v2278_v48  ;;  %v2153_v50 = vpop.f32.mrb[32].mxu1  ;;  %v4848_v48 = vld [vmem:[#allocation23_spill] sm:$0xff] }
 0x63b   : > { %v2155_v2 = vpop.f32.mrb[33].mxu1 }
 0x63c   : > { %v2342_v46 = vmul.f32 %v2310_v0, %v4838_v18  ;;  %v2279_v32 = vmul.f32 %v2155_v2, %v2153_v50 }
 0x63e   : > { %2374 = vst [vmem:[%s4632_s23 + $0x60] sm:$0xff] %v2342_v46  ;;  %v2311_v21 = vmul.f32 100.0, %v2279_v32  ;;  %v2159_v54 = vpop.f32.mrb[34].mxu1  ;;  %v4849_v32 = vld [vmem:[#allocation24_spill] sm:$0xff] }
 0x63f   : > { %v2161_v25 = vpop.f32.mrb[35].mxu1 }
 0x640   : > { %v2343_v8 = vmul.f32 %v2311_v21, %v4839_v3  ;;  %v2280_v16 = vmul.f32 %v2161_v25, %v2159_v54 }
 0x642   : > { %2375 = vst [vmem:[%s4632_s23 + $0x68] sm:$0xff] %v2343_v8  ;;  %v2312_v10 = vmul.f32 100.0, %v2280_v16  ;;  %v2165_v35 = vpop.f32.mrb[36].mxu1  ;;  %v4850_v16 = vld [vmem:[#allocation25_spill] sm:$0xff] }
 0x643   : > { %v2167_v1 = vpop.f32.mrb[37].mxu1 }
 0x644   : > { %v2344_v17 = vmul.f32 %v2312_v10, %v4840_v37  ;;  %v2281_v20 = vmul.f32 %v2167_v1, %v2165_v35 }
 0x646   : > { %2376 = vst [vmem:[%s4632_s23 + $0x70] sm:$0xff] %v2344_v17  ;;  %v2313_v45 = vmul.f32 100.0, %v2281_v20  ;;  %v4851_v20 = vld [vmem:[#allocation26_spill] sm:$0xff] }
 0x648   : > { %v2345_v24 = vmul.f32 %v2313_v45, %v4841_v19 }
 0x64a   : > { %2377 = vst [vmem:[%s4632_s23 + $0x78] sm:$0xff] %v2345_v24 }
 0x64f   : > { %v2171_v55 = vpop.f32.mrb[38].mxu1 }
 0x650   : > { %v2173_v30 = vpop.f32.mrb[39].mxu1 }
 0x651   : > { %v2282_v38 = vmul.f32 %v2173_v30, %v2171_v55 }
 0x653   : > { %v2314_v28 = vmul.f32 100.0, %v2282_v38  ;;  %v4852_v38 = vld [vmem:[#allocation27_spill] sm:$0xff] }
 0x655   : > { %v2346_v40 = vmul.f32 %v2314_v28, %v4842_v14 }
 0x656   : > { %v2177_v42 = vpop.f32.mrb[40].mxu1 }
 0x657   : > { %v2179_v13 = vpop.f32.mrb[41].mxu1  ;;  %2378 = vst [vmem:[%s4632_s23 + $0x80] sm:$0xff] %v2346_v40 }
 0x658   : > { %v2283_v29 = vmul.f32 %v2179_v13, %v2177_v42 }
 0x65a   : > { %v2315_v47 = vmul.f32 100.0, %v2283_v29  ;;  %v2183_v39 = vpop.f32.mrb[42].mxu1  ;;  %v4853_v29 = vld [vmem:[#allocation28_spill] sm:$0xff] }
 0x65b   : > { %v2185_v44 = vpop.f32.mrb[43].mxu1 }
 0x65c   : > { %v2347_v22 = vmul.f32 %v2315_v47, %v4843_v62  ;;  %v2284_v53 = vmul.f32 %v2185_v44, %v2183_v39 }
 0x65e   : > { %2379 = vst [vmem:[%s4632_s23 + $0x88] sm:$0xff] %v2347_v22  ;;  %v2316_v57 = vmul.f32 100.0, %v2284_v53  ;;  %v2189_v52 = vpop.f32.mrb[44].mxu1  ;;  %v4854_v53 = vld [vmem:[#allocation29_spill] sm:$0xff] }
 0x65f   : > { %v2191_v11 = vpop.f32.mrb[45].mxu1 }
 0x660   : > { %v2348_v31 = vmul.f32 %v2316_v57, %v4844_v7  ;;  %v2285_v23 = vmul.f32 %v2191_v11, %v2189_v52 }
 0x662   : > { %2380 = vst [vmem:[%s4632_s23 + $0x90] sm:$0xff] %v2348_v31  ;;  %v2317_v43 = vmul.f32 100.0, %v2285_v23  ;;  %v2195_v61 = vpop.f32.mrb[46].mxu1  ;;  %v4855_v23 = vld [vmem:[#allocation30_spill] sm:$0xff] }
 0x663   : > { %v2197_v59 = vpop.f32.mrb[47].mxu1 }
 0x664   : > { %v2349_v49 = vmul.f32 %v2317_v43, %v4845_v51  ;;  %v2286_v60 = vmul.f32 %v2197_v59, %v2195_v61  ;;  %v4856_v51 = vld [vmem:[#allocation31_spill] sm:$0xff] }
 0x666   : > { %2381 = vst [vmem:[%s4632_s23 + $0x98] sm:$0xff] %v2349_v49  ;;  %v2318_v6 = vmul.f32 100.0, %v2286_v60  ;;  %v2201_v33 = vpop.f32.mrb[48].mxu1 }
 0x667   : > { %v2203_v4 = vpop.f32.mrb[49].mxu1 }
 0x668   : > { %v2350_v41 = vmul.f32 %v2318_v6, %v4846_v27  ;;  %v2287_v5 = vmul.f32 %v2203_v4, %v2201_v33  ;;  %v4857_v27 = vld [vmem:[#allocation32_spill] sm:$0xff] }
 0x66a   : > { %2382 = vst [vmem:[%s4632_s23 + $0xa0] sm:$0xff] %v2350_v41  ;;  %v2319_v34 = vmul.f32 100.0, %v2287_v5  ;;  %v2207_v56 = vpop.f32.mrb[50].mxu1 }
 0x66b   : > { %v2209_v15 = vpop.f32.mrb[51].mxu1 }
 0x66c   : > { %v2351_v63 = vmul.f32 %v2319_v34, %v4847_v12  ;;  %v2288_v36 = vmul.f32 %v2209_v15, %v2207_v56 }
 0x66e   : > { %2383 = vst [vmem:[%s4632_s23 + $0xa8] sm:$0xff] %v2351_v63  ;;  %v2320_v26 = vmul.f32 100.0, %v2288_v36  ;;  %v2213_v58 = vpop.f32.mrb[52].mxu1 }
 0x66f   : > { %v2215_v9 = vpop.f32.mrb[53].mxu1 }
 0x670   : > { %v2352_v0 = vmul.f32 %v2320_v26, %v4848_v48  ;;  %v2289_v50 = vmul.f32 %v2215_v9, %v2213_v58 }
 0x672   : > { %2384 = vst [vmem:[%s4632_s23 + $0xb0] sm:$0xff] %v2352_v0  ;;  %v2321_v2 = vmul.f32 100.0, %v2289_v50  ;;  %v2219_v18 = vpop.f32.mrb[54].mxu1 }
 0x673   : > { %v2221_v46 = vpop.f32.mrb[55].mxu1 }
 0x674   : > { %v2353_v21 = vmul.f32 %v2321_v2, %v4849_v32  ;;  %v2290_v54 = vmul.f32 %v2221_v46, %v2219_v18 }
 0x676   : > { %2385 = vst [vmem:[%s4632_s23 + $0xb8] sm:$0xff] %v2353_v21  ;;  %v2322_v25 = vmul.f32 100.0, %v2290_v54  ;;  %v2225_v3 = vpop.f32.mrb[56].mxu1 }
 0x677   : > { %v2227_v8 = vpop.f32.mrb[57].mxu1 }
 0x678   : > { %v2354_v10 = vmul.f32 %v2322_v25, %v4850_v16  ;;  %v2291_v35 = vmul.f32 %v2227_v8, %v2225_v3 }
 0x67a   : > { %2386 = vst [vmem:[%s4632_s23 + $0xc0] sm:$0xff] %v2354_v10  ;;  %v2323_v1 = vmul.f32 100.0, %v2291_v35  ;;  %v2231_v37 = vpop.f32.mrb[58].mxu1 }
 0x67b   : > { %v2233_v17 = vpop.f32.mrb[59].mxu1 }
 0x67c   : > { %v2355_v45 = vmul.f32 %v2323_v1, %v4851_v20  ;;  %v2292_v19 = vmul.f32 %v2233_v17, %v2231_v37 }
 0x67e   : > { %2387 = vst [vmem:[%s4632_s23 + $0xc8] sm:$0xff] %v2355_v45  ;;  %v2324_v24 = vmul.f32 100.0, %v2292_v19  ;;  %v2237_v55 = vpop.f32.mrb[60].mxu1 }
 0x67f   : > { %v2239_v30 = vpop.f32.mrb[61].mxu1 }
 0x680   : > { %v2356_v28 = vmul.f32 %v2324_v24, %v4852_v38  ;;  %v2293_v14 = vmul.f32 %v2239_v30, %v2237_v55 }
 0x682   : > { %2388 = vst [vmem:[%s4632_s23 + $0xd0] sm:$0xff] %v2356_v28  ;;  %v2325_v40 = vmul.f32 100.0, %v2293_v14  ;;  %v2243_v42 = vpop.f32.mrb[62].mxu1 }
 0x683   : > { %v2245_v13 = vpop.f32.mrb[63].mxu1 }
 0x684   : > { %v2357_v47 = vmul.f32 %v2325_v40, %v4853_v29  ;;  %v2294_v39 = vmul.f32 %v2245_v13, %v2243_v42 }
 0x686   : > { %2389 = vst [vmem:[%s4632_s23 + $0xd8] sm:$0xff] %v2357_v47  ;;  %v2326_v44 = vmul.f32 100.0, %v2294_v39  ;;  %v2249_v62 = vpop.f32.mrb[64].mxu1 }
 0x687   : > { %v2251_v22 = vpop.f32.mrb[65].mxu1 }
 0x688   : > { %v2358_v57 = vmul.f32 %v2326_v44, %v4854_v53  ;;  %v2295_v52 = vmul.f32 %v2251_v22, %v2249_v62 }
 0x68a   : > { %2390 = vst [vmem:[%s4632_s23 + $0xe0] sm:$0xff] %v2358_v57  ;;  %v2327_v11 = vmul.f32 100.0, %v2295_v52  ;;  %v2255_v7 = vpop.f32.mrb[66].mxu1 }
 0x68b   : > { %v2257_v31 = vpop.f32.mrb[67].mxu1 }
 0x68c   : > { %v2359_v43 = vmul.f32 %v2327_v11, %v4855_v23  ;;  %v2296_v61 = vmul.f32 %v2257_v31, %v2255_v7 }
 0x68e   : > { %2391 = vst [vmem:[%s4632_s23 + $0xe8] sm:$0xff] %v2359_v43  ;;  %v2328_v59 = vmul.f32 100.0, %v2296_v61 }
 0x690   : > { %v2360_v49 = vmul.f32 %v2328_v59, %v4856_v51 }
 0x692   : > { %2392 = vst [vmem:[%s4632_s23 + $0xf0] sm:$0xff] %v2360_v49 }
 0x6b6   : > { %v2261_v60 = vpop.f32.mrb[68].mxu1 }
 0x6b7   : > { %v2263_v6 = vpop.f32.mrb[69].mxu1 }
 0x6b8   : > { %v2297_v33 = vmul.f32 %v2263_v6, %v2261_v60 }
 0x6ba   : > { %v2329_v4 = vmul.f32 100.0, %v2297_v33 }
 0x6bc   : > { %v2361_v41 = vmul.f32 %v2329_v4, %v4857_v27 }
 0x6be   : > { %2393 = vst [vmem:[%s4632_s23 + $0xf8] sm:$0xff] %v2361_v41 }
 0x6bf PF: > { %s12_s9 = sadd.s32 1, %s3073_s9  }
 0x6c0   : > { %p9_p4 = scmp.ge.s32.totalorder %s12_s9, 4  }
 0x6c2   :  { %11 = sbr.rel (!%p9_p4) target bundleno = 1 (0x1), region = 58 }

</bundles_post_ra>
